<compile_context>
chip_gen: v7x
topology: tpu7x:2x2x1
jax: 0.10.0
libtpu: 0.0.40
codegen_flags: <defaults>
</compile_context>

<pallas_src>
import jax
import jax.numpy as jnp
from jax.experimental import pallas as pl
from jax.experimental.pallas import tpu as pltpu


def make_lstm_kernel(num_layers: int, T: int, B: int, H: int, compute_dtype):
    """Builds a Pallas kernel computing the full LSTM recurrence + classifier."""

    def kernel(*args):
        # args = [x2d, (wihT, whhT, b) * num_layers, fc1wT, fc1b, fc2w_row, fc2b,
        #         out_ref, pg_scratch, hseq_scratch]
        x_ref = args[0]
        layer_refs = args[1:1 + 3 * num_layers]
        fc1w_ref, fc1b_ref, fc2w_ref, fc2b_ref = args[1 + 3 * num_layers:
                                                      5 + 3 * num_layers]
        out_ref, pg_ref, hseq_ref = args[5 + 3 * num_layers:]
        # pg_ref  : (T*B, 4H) f32 VMEM scratch holding hoisted pre-gates of current layer
        # hseq_ref: (T*B, H)  compute_dtype VMEM scratch holding previous layer's outputs

        def run_layer(seq_in, wih_ref, whh_ref, b_ref, write_out):
            # (1) Hoisted input projection + bias: one batched matmul, off the
            #     serial critical path (x@W_ih has no sequential dependency).
            pg_ref[...] = (jnp.dot(seq_in, wih_ref[...],
                                   preferred_element_type=jnp.float32)
                           + b_ref[...])                       # (T*B, 4H) f32

            whhT = whh_ref[...]                                # (H, 4H) compute_dtype
            h = jnp.zeros((B, H), jnp.float32)
            c = jnp.zeros((B, H), jnp.float32)

            # (2) Fully unrolled recurrence (T static): only h @ W_hh remains on
            #     the serial path; static slices of the pre-gate scratch.
            for t in range(T):
                gates = pg_ref[t * B:(t + 1) * B, :] + jnp.dot(
                    h.astype(compute_dtype), whhT,
                    preferred_element_type=jnp.float32)        # (B, 4H) f32
                # PyTorch gate order: input, forget, cell(g), output
                i = jax.nn.sigmoid(gates[:, 0:H])
                f = jax.nn.sigmoid(gates[:, H:2 * H])
                g = jnp.tanh(gates[:, 2 * H:3 * H])
                o = jax.nn.sigmoid(gates[:, 3 * H:4 * H])
                c = f * c + i * g
                h = o * jnp.tanh(c)
                if write_out:
                    hseq_ref[t * B:(t + 1) * B, :] = h.astype(compute_dtype)
            return h

        # Layer 0 reads the flattened input sequence.
        h = run_layer(x_ref[...], layer_refs[0], layer_refs[1], layer_refs[2],
                      write_out=(num_layers > 1))
        # Subsequent layers read the previous layer's output sequence from scratch.
        for l in range(1, num_layers):
            wih_ref, whh_ref, b_ref = layer_refs[3 * l:3 * l + 3]
            h = run_layer(hseq_ref[...], wih_ref, whh_ref, b_ref,
                          write_out=(l < num_layers - 1))

        # classifier: Linear -> ReLU -> (Dropout: identity in eval) -> Linear(1)
        z = jnp.maximum(
            jnp.dot(h.astype(compute_dtype), fc1w_ref[...],
                    preferred_element_type=jnp.float32) + fc1b_ref[...], 0.0)
        # fc2 is (H -> 1): VPU multiply + lane reduction instead of an N=1 MXU matmul.
        out = jnp.sum(z * fc2w_ref[...], axis=-1, keepdims=True) + fc2b_ref[...]
        out_ref[...] = out                                      # (B, 1)

    return kernel


def lstm_model_forward(x, params, num_layers, hidden_size,
                       compute_dtype=jnp.float32):
    """x: (B, T, D) batch_first, float32. Returns (B, 1) float32."""
    B, T, D = x.shape
    H = hidden_size

    # time-major flatten: row t*B + b  <-> (timestep t, batch b)
    x2d = jnp.transpose(x, (1, 0, 2)).reshape(T * B, D).astype(compute_dtype)

    args = [x2d]
    for l in range(num_layers):
        wih = params[f'w_ih_{l}']                 # (4H, D_in)
        whh = params[f'w_hh_{l}']                 # (4H, H)
        b = (params[f'b_ih_{l}'] + params[f'b_hh_{l}']).reshape(1, 4 * H)
        args += [wih.T.astype(compute_dtype),
                 whh.T.astype(compute_dtype),
                 b.astype(jnp.float32)]
    args += [params['fc1_w'].T.astype(compute_dtype),       # (H, H)
             params['fc1_b'].reshape(1, H).astype(jnp.float32),
             params['fc2_w'].reshape(1, H).astype(jnp.float32),  # row vector for VPU head
             params['fc2_b'].reshape(1, 1).astype(jnp.float32)]
    n_in = len(args)

    return pl.pallas_call(
        make_lstm_kernel(num_layers, T, B, H, compute_dtype),
        out_shape=jax.ShapeDtypeStruct((B, 1), jnp.float32),
        in_specs=[pl.BlockSpec(memory_space=pltpu.MemorySpace.VMEM)] * n_in,
        out_specs=pl.BlockSpec(memory_space=pltpu.MemorySpace.VMEM),
        scratch_shapes=[pltpu.VMEM((T * B, 4 * H), jnp.float32),   # pre-gates
                        pltpu.VMEM((T * B, H), compute_dtype)],    # hidden seq
    )(*args)


def init_params(key, input_size, hidden_size, num_layers):
    """Deterministic init matching PyTorch shapes (uniform(-1/sqrt(H), 1/sqrt(H)))."""
    H = hidden_size
    k = 1.0 / (H ** 0.5)
    params = {}
    for l in range(num_layers):
        d_in = input_size if l == 0 else H
        key, k1, k2, k3, k4 = jax.random.split(key, 5)
        params[f'w_ih_{l}'] = jax.random.uniform(k1, (4 * H, d_in), jnp.float32, -k, k)
        params[f'w_hh_{l}'] = jax.random.uniform(k2, (4 * H, H), jnp.float32, -k, k)
        params[f'b_ih_{l}'] = jax.random.uniform(k3, (4 * H,), jnp.float32, -k, k)
        params[f'b_hh_{l}'] = jax.random.uniform(k4, (4 * H,), jnp.float32, -k, k)
    key, k1, k2, k3, k4 = jax.random.split(key, 5)
    params['fc1_w'] = jax.random.uniform(k1, (H, H), jnp.float32, -k, k)
    params['fc1_b'] = jax.random.uniform(k2, (H,), jnp.float32, -k, k)
    params['fc2_w'] = jax.random.uniform(k3, (1, H), jnp.float32, -k, k)
    params['fc2_b'] = jax.random.uniform(k4, (1,), jnp.float32, -k, k)
    return params


def lstm_model_reference(x, params, num_layers, hidden_size,
                         compute_dtype=jnp.float32):
    """Pure-JAX reference of the PyTorch forward (eval mode), dtype-matched."""
    B, T, D = x.shape
    H = hidden_size
    inp = x.astype(compute_dtype)
    h = jnp.zeros((B, H), jnp.float32)
    for l in range(num_layers):
        wihT = params[f'w_ih_{l}'].T.astype(compute_dtype)
        whhT = params[f'w_hh_{l}'].T.astype(compute_dtype)
        b = (params[f'b_ih_{l}'] + params[f'b_hh_{l}']).astype(jnp.float32)
        h = jnp.zeros((B, H), jnp.float32)
        c = jnp.zeros((B, H), jnp.float32)
        outs = []
        for t in range(T):
            g = (jnp.dot(inp[:, t, :], wihT, preferred_element_type=jnp.float32)
                 + jnp.dot(h.astype(compute_dtype), whhT,
                           preferred_element_type=jnp.float32)
                 + b)
            i = jax.nn.sigmoid(g[:, :H])
            f = jax.nn.sigmoid(g[:, H:2 * H])
            gg = jnp.tanh(g[:, 2 * H:3 * H])
            o = jax.nn.sigmoid(g[:, 3 * H:])
            c = f * c + i * gg
            h = o * jnp.tanh(c)
            outs.append(h.astype(compute_dtype))
        inp = jnp.stack(outs, axis=1)
    z = jnp.maximum(
        jnp.dot(h.astype(compute_dtype), params['fc1_w'].T.astype(compute_dtype),
                preferred_element_type=jnp.float32) + params['fc1_b'], 0.0)
    return jnp.sum(z * params['fc2_w'], axis=-1, keepdims=True) + params['fc2_b']


if __name__ == "__main__":
    # Small shapes consistent with the module: batch=2, seq=8, input=16, hidden=32, layers=2.
    batch, seq_len, input_size, hidden_size, num_layers = 2, 8, 16, 32, 2

    key = jax.random.PRNGKey(0)
    key, xkey, pkey = jax.random.split(key, 3)
    x = jax.random.normal(xkey, (batch, seq_len, input_size), jnp.float32)
    params = init_params(pkey, input_size, hidden_size, num_layers)

    # f32 path: exact eval-mode semantics of the PyTorch module.
    out = jax.block_until_ready(
        lstm_model_forward(x, params, num_layers, hidden_size))
    ref = lstm_model_reference(x, params, num_layers, hidden_size)
    assert out.shape == (batch, 1)
    assert jnp.allclose(out, ref, atol=1e-4, rtol=1e-4), (out, ref)

    # bf16 compute path (v6e/v7x MXU-friendly), checked against a dtype-matched reference.
    out_bf16 = jax.block_until_ready(
        lstm_model_forward(x, params, num_layers, hidden_size,
                           compute_dtype=jnp.bfloat16))
    ref_bf16 = lstm_model_reference(x, params, num_layers, hidden_size,
                                    compute_dtype=jnp.bfloat16)
    assert jnp.allclose(out_bf16, ref_bf16, atol=1e-3, rtol=1e-3), (out_bf16, ref_bf16)

    print("KERNEL_OK")
</pallas_src>

<mosaic_0001>
module attributes {stable_mosaic.version = 11 : i64} {
  func.func @kernel(%arg0: memref<16x16xf32, #tpu.memory_space<vmem>>, %arg1: memref<16x128xf32, #tpu.memory_space<vmem>>, %arg2: memref<32x128xf32, #tpu.memory_space<vmem>>, %arg3: memref<1x128xf32, #tpu.memory_space<vmem>>, %arg4: memref<32x128xf32, #tpu.memory_space<vmem>>, %arg5: memref<32x128xf32, #tpu.memory_space<vmem>>, %arg6: memref<1x128xf32, #tpu.memory_space<vmem>>, %arg7: memref<32x32xf32, #tpu.memory_space<vmem>>, %arg8: memref<1x32xf32, #tpu.memory_space<vmem>>, %arg9: memref<1x32xf32, #tpu.memory_space<vmem>>, %arg10: memref<1x1xf32, #tpu.memory_space<vmem>>, %arg11: memref<2x1xf32, #tpu.memory_space<vmem>>, %arg12: memref<16x128xf32, #tpu.memory_space<vmem>>, %arg13: memref<16x32xf32, #tpu.memory_space<vmem>>) attributes {dimension_semantics = [], scalar_prefetch = 0 : i64, scratch_operands = 2 : i64, tpu.core_type = #tpu.core_type<tc>} {
    %c0 = arith.constant 0 : index
    %c0_0 = arith.constant 0 : index
    %0 = vector.load %arg0[%c0, %c0_0] : memref<16x16xf32, #tpu.memory_space<vmem>>, vector<16x16xf32>
    %c0_1 = arith.constant 0 : index
    %c0_2 = arith.constant 0 : index
    %1 = vector.load %arg1[%c0_1, %c0_2] : memref<16x128xf32, #tpu.memory_space<vmem>>, vector<16x128xf32>
    %cst = arith.constant dense<0.000000e+00> : vector<16x128xf32>
    %2 = tpu.matmul %0, %1, %cst {dimension_numbers = #tpu.dot_dimension_numbers<[1], [0], [0], [1], [0, 0, 1, 1], [], []>} : vector<16x16xf32>, vector<16x128xf32>, vector<16x128xf32> -> vector<16x128xf32>
    %c0_3 = arith.constant 0 : index
    %c0_4 = arith.constant 0 : index
    %3 = vector.load %arg3[%c0_3, %c0_4] : memref<1x128xf32, #tpu.memory_space<vmem>>, vector<1x128xf32>
    %4 = vector.broadcast %3 : vector<1x128xf32> to vector<16x128xf32>
    %5 = arith.addf %2, %4 : vector<16x128xf32>
    %c0_5 = arith.constant 0 : index
    %c0_6 = arith.constant 0 : index
    %6 = vector.load %arg12[%c0_5, %c0_6] : memref<16x128xf32, #tpu.memory_space<vmem>>, vector<16x128xf32>
    tpu.vector_store %arg12[%c0_5, %c0_6], %5 {strides = array<i32>} : memref<16x128xf32, #tpu.memory_space<vmem>>, vector<16x128xf32>,
    %c0_7 = arith.constant 0 : index
    %c0_8 = arith.constant 0 : index
    %7 = vector.load %arg2[%c0_7, %c0_8] : memref<32x128xf32, #tpu.memory_space<vmem>>, vector<32x128xf32>
    %cst_9 = arith.constant 0.000000e+00 : f32
    %8 = vector.broadcast %cst_9 : f32 to vector<2x32xf32>
    %cst_10 = arith.constant 0.000000e+00 : f32
    %9 = vector.broadcast %cst_10 : f32 to vector<2x32xf32>
    %c0_11 = arith.constant 0 : index
    %c0_12 = arith.constant 0 : index
    %10 = vector.load %arg12[%c0_11, %c0_12] : memref<16x128xf32, #tpu.memory_space<vmem>>, vector<2x128xf32>
    %cst_13 = arith.constant dense<0.000000e+00> : vector<2x128xf32>
    %11 = tpu.matmul %8, %7, %cst_13 {dimension_numbers = #tpu.dot_dimension_numbers<[1], [0], [0], [1], [0, 0, 1, 1], [], []>} : vector<2x32xf32>, vector<32x128xf32>, vector<2x128xf32> -> vector<2x128xf32>
    %12 = arith.addf %10, %11 : vector<2x128xf32>
    %13 = vector.extract_strided_slice %12 {offsets = [0, 0], sizes = [2, 32], strides = [1, 1]} : vector<2x128xf32> to vector<2x32xf32>
    %14 = arith.negf %13 : vector<2x32xf32>
    %15 = math.exp %14 : vector<2x32xf32>
    %cst_14 = arith.constant 1.000000e+00 : f32
    %16 = vector.broadcast %cst_14 : f32 to vector<2x32xf32>
    %17 = arith.addf %16, %15 : vector<2x32xf32>
    %18 = arith.divf %16, %17 : vector<2x32xf32>
    %19 = vector.extract_strided_slice %12 {offsets = [0, 32], sizes = [2, 32], strides = [1, 1]} : vector<2x128xf32> to vector<2x32xf32>
    %20 = arith.negf %19 : vector<2x32xf32>
    %21 = math.exp %20 : vector<2x32xf32>
    %cst_15 = arith.constant 1.000000e+00 : f32
    %22 = vector.broadcast %cst_15 : f32 to vector<2x32xf32>
    %23 = arith.addf %22, %21 : vector<2x32xf32>
    %24 = arith.divf %22, %23 : vector<2x32xf32>
    %25 = vector.extract_strided_slice %12 {offsets = [0, 64], sizes = [2, 32], strides = [1, 1]} : vector<2x128xf32> to vector<2x32xf32>
    %26 = math.tanh %25 : vector<2x32xf32>
    %27 = vector.extract_strided_slice %12 {offsets = [0, 96], sizes = [2, 32], strides = [1, 1]} : vector<2x128xf32> to vector<2x32xf32>
    %28 = arith.negf %27 : vector<2x32xf32>
    %29 = math.exp %28 : vector<2x32xf32>
    %cst_16 = arith.constant 1.000000e+00 : f32
    %30 = vector.broadcast %cst_16 : f32 to vector<2x32xf32>
    %31 = arith.addf %30, %29 : vector<2x32xf32>
    %32 = arith.divf %30, %31 : vector<2x32xf32>
    %33 = arith.mulf %24, %9 : vector<2x32xf32>
    %34 = arith.mulf %18, %26 : vector<2x32xf32>
    %35 = arith.addf %33, %34 : vector<2x32xf32>
    %36 = math.tanh %35 : vector<2x32xf32>
    %37 = arith.mulf %32, %36 : vector<2x32xf32>
    %c0_17 = arith.constant 0 : index
    %c0_18 = arith.constant 0 : index
    %38 = vector.load %arg13[%c0_17, %c0_18] : memref<16x32xf32, #tpu.memory_space<vmem>>, vector<2x32xf32>
    tpu.vector_store %arg13[%c0_17, %c0_18], %37 {strides = array<i32>} : memref<16x32xf32, #tpu.memory_space<vmem>>, vector<2x32xf32>,
    %c2 = arith.constant 2 : index
    %c0_19 = arith.constant 0 : index
    %39 = vector.load %arg12[%c2, %c0_19] : memref<16x128xf32, #tpu.memory_space<vmem>>, vector<2x128xf32>
    %cst_20 = arith.constant dense<0.000000e+00> : vector<2x128xf32>
    %40 = tpu.matmul %37, %7, %cst_20 {dimension_numbers = #tpu.dot_dimension_numbers<[1], [0], [0], [1], [0, 0, 1, 1], [], []>} : vector<2x32xf32>, vector<32x128xf32>, vector<2x128xf32> -> vector<2x128xf32>
    %41 = arith.addf %39, %40 : vector<2x128xf32>
    %42 = vector.extract_strided_slice %41 {offsets = [0, 0], sizes = [2, 32], strides = [1, 1]} : vector<2x128xf32> to vector<2x32xf32>
    %43 = arith.negf %42 : vector<2x32xf32>
    %44 = math.exp %43 : vector<2x32xf32>
    %cst_21 = arith.constant 1.000000e+00 : f32
    %45 = vector.broadcast %cst_21 : f32 to vector<2x32xf32>
    %46 = arith.addf %45, %44 : vector<2x32xf32>
    %47 = arith.divf %45, %46 : vector<2x32xf32>
    %48 = vector.extract_strided_slice %41 {offsets = [0, 32], sizes = [2, 32], strides = [1, 1]} : vector<2x128xf32> to vector<2x32xf32>
    %49 = arith.negf %48 : vector<2x32xf32>
    %50 = math.exp %49 : vector<2x32xf32>
    %cst_22 = arith.constant 1.000000e+00 : f32
    %51 = vector.broadcast %cst_22 : f32 to vector<2x32xf32>
    %52 = arith.addf %51, %50 : vector<2x32xf32>
    %53 = arith.divf %51, %52 : vector<2x32xf32>
    %54 = vector.extract_strided_slice %41 {offsets = [0, 64], sizes = [2, 32], strides = [1, 1]} : vector<2x128xf32> to vector<2x32xf32>
    %55 = math.tanh %54 : vector<2x32xf32>
    %56 = vector.extract_strided_slice %41 {offsets = [0, 96], sizes = [2, 32], strides = [1, 1]} : vector<2x128xf32> to vector<2x32xf32>
    %57 = arith.negf %56 : vector<2x32xf32>
    %58 = math.exp %57 : vector<2x32xf32>
    %cst_23 = arith.constant 1.000000e+00 : f32
    %59 = vector.broadcast %cst_23 : f32 to vector<2x32xf32>
    %60 = arith.addf %59, %58 : vector<2x32xf32>
    %61 = arith.divf %59, %60 : vector<2x32xf32>
    %62 = arith.mulf %53, %35 : vector<2x32xf32>
    %63 = arith.mulf %47, %55 : vector<2x32xf32>
    %64 = arith.addf %62, %63 : vector<2x32xf32>
    %65 = math.tanh %64 : vector<2x32xf32>
    %66 = arith.mulf %61, %65 : vector<2x32xf32>
    %c2_24 = arith.constant 2 : index
    %c0_25 = arith.constant 0 : index
    %67 = vector.load %arg13[%c2_24, %c0_25] : memref<16x32xf32, #tpu.memory_space<vmem>>, vector<2x32xf32>
    tpu.vector_store %arg13[%c2_24, %c0_25], %66 {strides = array<i32>} : memref<16x32xf32, #tpu.memory_space<vmem>>, vector<2x32xf32>,
    %c4 = arith.constant 4 : index
    %c0_26 = arith.constant 0 : index
    %68 = vector.load %arg12[%c4, %c0_26] : memref<16x128xf32, #tpu.memory_space<vmem>>, vector<2x128xf32>
    %cst_27 = arith.constant dense<0.000000e+00> : vector<2x128xf32>
    %69 = tpu.matmul %66, %7, %cst_27 {dimension_numbers = #tpu.dot_dimension_numbers<[1], [0], [0], [1], [0, 0, 1, 1], [], []>} : vector<2x32xf32>, vector<32x128xf32>, vector<2x128xf32> -> vector<2x128xf32>
    %70 = arith.addf %68, %69 : vector<2x128xf32>
    %71 = vector.extract_strided_slice %70 {offsets = [0, 0], sizes = [2, 32], strides = [1, 1]} : vector<2x128xf32> to vector<2x32xf32>
    %72 = arith.negf %71 : vector<2x32xf32>
    %73 = math.exp %72 : vector<2x32xf32>
    %cst_28 = arith.constant 1.000000e+00 : f32
    %74 = vector.broadcast %cst_28 : f32 to vector<2x32xf32>
    %75 = arith.addf %74, %73 : vector<2x32xf32>
    %76 = arith.divf %74, %75 : vector<2x32xf32>
    %77 = vector.extract_strided_slice %70 {offsets = [0, 32], sizes = [2, 32], strides = [1, 1]} : vector<2x128xf32> to vector<2x32xf32>
    %78 = arith.negf %77 : vector<2x32xf32>
    %79 = math.exp %78 : vector<2x32xf32>
    %cst_29 = arith.constant 1.000000e+00 : f32
    %80 = vector.broadcast %cst_29 : f32 to vector<2x32xf32>
    %81 = arith.addf %80, %79 : vector<2x32xf32>
    %82 = arith.divf %80, %81 : vector<2x32xf32>
    %83 = vector.extract_strided_slice %70 {offsets = [0, 64], sizes = [2, 32], strides = [1, 1]} : vector<2x128xf32> to vector<2x32xf32>
    %84 = math.tanh %83 : vector<2x32xf32>
    %85 = vector.extract_strided_slice %70 {offsets = [0, 96], sizes = [2, 32], strides = [1, 1]} : vector<2x128xf32> to vector<2x32xf32>
    %86 = arith.negf %85 : vector<2x32xf32>
    %87 = math.exp %86 : vector<2x32xf32>
    %cst_30 = arith.constant 1.000000e+00 : f32
    %88 = vector.broadcast %cst_30 : f32 to vector<2x32xf32>
    %89 = arith.addf %88, %87 : vector<2x32xf32>
    %90 = arith.divf %88, %89 : vector<2x32xf32>
    %91 = arith.mulf %82, %64 : vector<2x32xf32>
    %92 = arith.mulf %76, %84 : vector<2x32xf32>
    %93 = arith.addf %91, %92 : vector<2x32xf32>
    %94 = math.tanh %93 : vector<2x32xf32>
    %95 = arith.mulf %90, %94 : vector<2x32xf32>
    %c4_31 = arith.constant 4 : index
    %c0_32 = arith.constant 0 : index
    %96 = vector.load %arg13[%c4_31, %c0_32] : memref<16x32xf32, #tpu.memory_space<vmem>>, vector<2x32xf32>
    tpu.vector_store %arg13[%c4_31, %c0_32], %95 {strides = array<i32>} : memref<16x32xf32, #tpu.memory_space<vmem>>, vector<2x32xf32>,
    %c6 = arith.constant 6 : index
    %c0_33 = arith.constant 0 : index
    %97 = vector.load %arg12[%c6, %c0_33] : memref<16x128xf32, #tpu.memory_space<vmem>>, vector<2x128xf32>
    %cst_34 = arith.constant dense<0.000000e+00> : vector<2x128xf32>
    %98 = tpu.matmul %95, %7, %cst_34 {dimension_numbers = #tpu.dot_dimension_numbers<[1], [0], [0], [1], [0, 0, 1, 1], [], []>} : vector<2x32xf32>, vector<32x128xf32>, vector<2x128xf32> -> vector<2x128xf32>
    %99 = arith.addf %97, %98 : vector<2x128xf32>
    %100 = vector.extract_strided_slice %99 {offsets = [0, 0], sizes = [2, 32], strides = [1, 1]} : vector<2x128xf32> to vector<2x32xf32>
    %101 = arith.negf %100 : vector<2x32xf32>
    %102 = math.exp %101 : vector<2x32xf32>
    %cst_35 = arith.constant 1.000000e+00 : f32
    %103 = vector.broadcast %cst_35 : f32 to vector<2x32xf32>
    %104 = arith.addf %103, %102 : vector<2x32xf32>
    %105 = arith.divf %103, %104 : vector<2x32xf32>
    %106 = vector.extract_strided_slice %99 {offsets = [0, 32], sizes = [2, 32], strides = [1, 1]} : vector<2x128xf32> to vector<2x32xf32>
    %107 = arith.negf %106 : vector<2x32xf32>
    %108 = math.exp %107 : vector<2x32xf32>
    %cst_36 = arith.constant 1.000000e+00 : f32
    %109 = vector.broadcast %cst_36 : f32 to vector<2x32xf32>
    %110 = arith.addf %109, %108 : vector<2x32xf32>
    %111 = arith.divf %109, %110 : vector<2x32xf32>
    %112 = vector.extract_strided_slice %99 {offsets = [0, 64], sizes = [2, 32], strides = [1, 1]} : vector<2x128xf32> to vector<2x32xf32>
    %113 = math.tanh %112 : vector<2x32xf32>
    %114 = vector.extract_strided_slice %99 {offsets = [0, 96], sizes = [2, 32], strides = [1, 1]} : vector<2x128xf32> to vector<2x32xf32>
    %115 = arith.negf %114 : vector<2x32xf32>
    %116 = math.exp %115 : vector<2x32xf32>
    %cst_37 = arith.constant 1.000000e+00 : f32
    %117 = vector.broadcast %cst_37 : f32 to vector<2x32xf32>
    %118 = arith.addf %117, %116 : vector<2x32xf32>
    %119 = arith.divf %117, %118 : vector<2x32xf32>
    %120 = arith.mulf %111, %93 : vector<2x32xf32>
    %121 = arith.mulf %105, %113 : vector<2x32xf32>
    %122 = arith.addf %120, %121 : vector<2x32xf32>
    %123 = math.tanh %122 : vector<2x32xf32>
    %124 = arith.mulf %119, %123 : vector<2x32xf32>
    %c6_38 = arith.constant 6 : index
    %c0_39 = arith.constant 0 : index
    %125 = vector.load %arg13[%c6_38, %c0_39] : memref<16x32xf32, #tpu.memory_space<vmem>>, vector<2x32xf32>
    tpu.vector_store %arg13[%c6_38, %c0_39], %124 {strides = array<i32>} : memref<16x32xf32, #tpu.memory_space<vmem>>, vector<2x32xf32>,
    %c8 = arith.constant 8 : index
    %c0_40 = arith.constant 0 : index
    %126 = vector.load %arg12[%c8, %c0_40] : memref<16x128xf32, #tpu.memory_space<vmem>>, vector<2x128xf32>
    %cst_41 = arith.constant dense<0.000000e+00> : vector<2x128xf32>
    %127 = tpu.matmul %124, %7, %cst_41 {dimension_numbers = #tpu.dot_dimension_numbers<[1], [0], [0], [1], [0, 0, 1, 1], [], []>} : vector<2x32xf32>, vector<32x128xf32>, vector<2x128xf32> -> vector<2x128xf32>
    %128 = arith.addf %126, %127 : vector<2x128xf32>
    %129 = vector.extract_strided_slice %128 {offsets = [0, 0], sizes = [2, 32], strides = [1, 1]} : vector<2x128xf32> to vector<2x32xf32>
    %130 = arith.negf %129 : vector<2x32xf32>
    %131 = math.exp %130 : vector<2x32xf32>
    %cst_42 = arith.constant 1.000000e+00 : f32
    %132 = vector.broadcast %cst_42 : f32 to vector<2x32xf32>
    %133 = arith.addf %132, %131 : vector<2x32xf32>
    %134 = arith.divf %132, %133 : vector<2x32xf32>
    %135 = vector.extract_strided_slice %128 {offsets = [0, 32], sizes = [2, 32], strides = [1, 1]} : vector<2x128xf32> to vector<2x32xf32>
    %136 = arith.negf %135 : vector<2x32xf32>
    %137 = math.exp %136 : vector<2x32xf32>
    %cst_43 = arith.constant 1.000000e+00 : f32
    %138 = vector.broadcast %cst_43 : f32 to vector<2x32xf32>
    %139 = arith.addf %138, %137 : vector<2x32xf32>
    %140 = arith.divf %138, %139 : vector<2x32xf32>
    %141 = vector.extract_strided_slice %128 {offsets = [0, 64], sizes = [2, 32], strides = [1, 1]} : vector<2x128xf32> to vector<2x32xf32>
    %142 = math.tanh %141 : vector<2x32xf32>
    %143 = vector.extract_strided_slice %128 {offsets = [0, 96], sizes = [2, 32], strides = [1, 1]} : vector<2x128xf32> to vector<2x32xf32>
    %144 = arith.negf %143 : vector<2x32xf32>
    %145 = math.exp %144 : vector<2x32xf32>
    %cst_44 = arith.constant 1.000000e+00 : f32
    %146 = vector.broadcast %cst_44 : f32 to vector<2x32xf32>
    %147 = arith.addf %146, %145 : vector<2x32xf32>
    %148 = arith.divf %146, %147 : vector<2x32xf32>
    %149 = arith.mulf %140, %122 : vector<2x32xf32>
    %150 = arith.mulf %134, %142 : vector<2x32xf32>
    %151 = arith.addf %149, %150 : vector<2x32xf32>
    %152 = math.tanh %151 : vector<2x32xf32>
    %153 = arith.mulf %148, %152 : vector<2x32xf32>
    %c8_45 = arith.constant 8 : index
    %c0_46 = arith.constant 0 : index
    %154 = vector.load %arg13[%c8_45, %c0_46] : memref<16x32xf32, #tpu.memory_space<vmem>>, vector<2x32xf32>
    tpu.vector_store %arg13[%c8_45, %c0_46], %153 {strides = array<i32>} : memref<16x32xf32, #tpu.memory_space<vmem>>, vector<2x32xf32>,
    %c10 = arith.constant 10 : index
    %c0_47 = arith.constant 0 : index
    %155 = vector.load %arg12[%c10, %c0_47] : memref<16x128xf32, #tpu.memory_space<vmem>>, vector<2x128xf32>
    %cst_48 = arith.constant dense<0.000000e+00> : vector<2x128xf32>
    %156 = tpu.matmul %153, %7, %cst_48 {dimension_numbers = #tpu.dot_dimension_numbers<[1], [0], [0], [1], [0, 0, 1, 1], [], []>} : vector<2x32xf32>, vector<32x128xf32>, vector<2x128xf32> -> vector<2x128xf32>
    %157 = arith.addf %155, %156 : vector<2x128xf32>
    %158 = vector.extract_strided_slice %157 {offsets = [0, 0], sizes = [2, 32], strides = [1, 1]} : vector<2x128xf32> to vector<2x32xf32>
    %159 = arith.negf %158 : vector<2x32xf32>
    %160 = math.exp %159 : vector<2x32xf32>
    %cst_49 = arith.constant 1.000000e+00 : f32
    %161 = vector.broadcast %cst_49 : f32 to vector<2x32xf32>
    %162 = arith.addf %161, %160 : vector<2x32xf32>
    %163 = arith.divf %161, %162 : vector<2x32xf32>
    %164 = vector.extract_strided_slice %157 {offsets = [0, 32], sizes = [2, 32], strides = [1, 1]} : vector<2x128xf32> to vector<2x32xf32>
    %165 = arith.negf %164 : vector<2x32xf32>
    %166 = math.exp %165 : vector<2x32xf32>
    %cst_50 = arith.constant 1.000000e+00 : f32
    %167 = vector.broadcast %cst_50 : f32 to vector<2x32xf32>
    %168 = arith.addf %167, %166 : vector<2x32xf32>
    %169 = arith.divf %167, %168 : vector<2x32xf32>
    %170 = vector.extract_strided_slice %157 {offsets = [0, 64], sizes = [2, 32], strides = [1, 1]} : vector<2x128xf32> to vector<2x32xf32>
    %171 = math.tanh %170 : vector<2x32xf32>
    %172 = vector.extract_strided_slice %157 {offsets = [0, 96], sizes = [2, 32], strides = [1, 1]} : vector<2x128xf32> to vector<2x32xf32>
    %173 = arith.negf %172 : vector<2x32xf32>
    %174 = math.exp %173 : vector<2x32xf32>
    %cst_51 = arith.constant 1.000000e+00 : f32
    %175 = vector.broadcast %cst_51 : f32 to vector<2x32xf32>
    %176 = arith.addf %175, %174 : vector<2x32xf32>
    %177 = arith.divf %175, %176 : vector<2x32xf32>
    %178 = arith.mulf %169, %151 : vector<2x32xf32>
    %179 = arith.mulf %163, %171 : vector<2x32xf32>
    %180 = arith.addf %178, %179 : vector<2x32xf32>
    %181 = math.tanh %180 : vector<2x32xf32>
    %182 = arith.mulf %177, %181 : vector<2x32xf32>
    %c10_52 = arith.constant 10 : index
    %c0_53 = arith.constant 0 : index
    %183 = vector.load %arg13[%c10_52, %c0_53] : memref<16x32xf32, #tpu.memory_space<vmem>>, vector<2x32xf32>
    tpu.vector_store %arg13[%c10_52, %c0_53], %182 {strides = array<i32>} : memref<16x32xf32, #tpu.memory_space<vmem>>, vector<2x32xf32>,
    %c12 = arith.constant 12 : index
    %c0_54 = arith.constant 0 : index
    %184 = vector.load %arg12[%c12, %c0_54] : memref<16x128xf32, #tpu.memory_space<vmem>>, vector<2x128xf32>
    %cst_55 = arith.constant dense<0.000000e+00> : vector<2x128xf32>
    %185 = tpu.matmul %182, %7, %cst_55 {dimension_numbers = #tpu.dot_dimension_numbers<[1], [0], [0], [1], [0, 0, 1, 1], [], []>} : vector<2x32xf32>, vector<32x128xf32>, vector<2x128xf32> -> vector<2x128xf32>
    %186 = arith.addf %184, %185 : vector<2x128xf32>
    %187 = vector.extract_strided_slice %186 {offsets = [0, 0], sizes = [2, 32], strides = [1, 1]} : vector<2x128xf32> to vector<2x32xf32>
    %188 = arith.negf %187 : vector<2x32xf32>
    %189 = math.exp %188 : vector<2x32xf32>
    %cst_56 = arith.constant 1.000000e+00 : f32
    %190 = vector.broadcast %cst_56 : f32 to vector<2x32xf32>
    %191 = arith.addf %190, %189 : vector<2x32xf32>
    %192 = arith.divf %190, %191 : vector<2x32xf32>
    %193 = vector.extract_strided_slice %186 {offsets = [0, 32], sizes = [2, 32], strides = [1, 1]} : vector<2x128xf32> to vector<2x32xf32>
    %194 = arith.negf %193 : vector<2x32xf32>
    %195 = math.exp %194 : vector<2x32xf32>
    %cst_57 = arith.constant 1.000000e+00 : f32
    %196 = vector.broadcast %cst_57 : f32 to vector<2x32xf32>
    %197 = arith.addf %196, %195 : vector<2x32xf32>
    %198 = arith.divf %196, %197 : vector<2x32xf32>
    %199 = vector.extract_strided_slice %186 {offsets = [0, 64], sizes = [2, 32], strides = [1, 1]} : vector<2x128xf32> to vector<2x32xf32>
    %200 = math.tanh %199 : vector<2x32xf32>
    %201 = vector.extract_strided_slice %186 {offsets = [0, 96], sizes = [2, 32], strides = [1, 1]} : vector<2x128xf32> to vector<2x32xf32>
    %202 = arith.negf %201 : vector<2x32xf32>
    %203 = math.exp %202 : vector<2x32xf32>
    %cst_58 = arith.constant 1.000000e+00 : f32
    %204 = vector.broadcast %cst_58 : f32 to vector<2x32xf32>
    %205 = arith.addf %204, %203 : vector<2x32xf32>
    %206 = arith.divf %204, %205 : vector<2x32xf32>
    %207 = arith.mulf %198, %180 : vector<2x32xf32>
    %208 = arith.mulf %192, %200 : vector<2x32xf32>
    %209 = arith.addf %207, %208 : vector<2x32xf32>
    %210 = math.tanh %209 : vector<2x32xf32>
    %211 = arith.mulf %206, %210 : vector<2x32xf32>
    %c12_59 = arith.constant 12 : index
    %c0_60 = arith.constant 0 : index
    %212 = vector.load %arg13[%c12_59, %c0_60] : memref<16x32xf32, #tpu.memory_space<vmem>>, vector<2x32xf32>
    tpu.vector_store %arg13[%c12_59, %c0_60], %211 {strides = array<i32>} : memref<16x32xf32, #tpu.memory_space<vmem>>, vector<2x32xf32>,
    %c14 = arith.constant 14 : index
    %c0_61 = arith.constant 0 : index
    %213 = vector.load %arg12[%c14, %c0_61] : memref<16x128xf32, #tpu.memory_space<vmem>>, vector<2x128xf32>
    %cst_62 = arith.constant dense<0.000000e+00> : vector<2x128xf32>
    %214 = tpu.matmul %211, %7, %cst_62 {dimension_numbers = #tpu.dot_dimension_numbers<[1], [0], [0], [1], [0, 0, 1, 1], [], []>} : vector<2x32xf32>, vector<32x128xf32>, vector<2x128xf32> -> vector<2x128xf32>
    %215 = arith.addf %213, %214 : vector<2x128xf32>
    %216 = vector.extract_strided_slice %215 {offsets = [0, 0], sizes = [2, 32], strides = [1, 1]} : vector<2x128xf32> to vector<2x32xf32>
    %217 = arith.negf %216 : vector<2x32xf32>
    %218 = math.exp %217 : vector<2x32xf32>
    %cst_63 = arith.constant 1.000000e+00 : f32
    %219 = vector.broadcast %cst_63 : f32 to vector<2x32xf32>
    %220 = arith.addf %219, %218 : vector<2x32xf32>
    %221 = arith.divf %219, %220 : vector<2x32xf32>
    %222 = vector.extract_strided_slice %215 {offsets = [0, 32], sizes = [2, 32], strides = [1, 1]} : vector<2x128xf32> to vector<2x32xf32>
    %223 = arith.negf %222 : vector<2x32xf32>
    %224 = math.exp %223 : vector<2x32xf32>
    %cst_64 = arith.constant 1.000000e+00 : f32
    %225 = vector.broadcast %cst_64 : f32 to vector<2x32xf32>
    %226 = arith.addf %225, %224 : vector<2x32xf32>
    %227 = arith.divf %225, %226 : vector<2x32xf32>
    %228 = vector.extract_strided_slice %215 {offsets = [0, 64], sizes = [2, 32], strides = [1, 1]} : vector<2x128xf32> to vector<2x32xf32>
    %229 = math.tanh %228 : vector<2x32xf32>
    %230 = vector.extract_strided_slice %215 {offsets = [0, 96], sizes = [2, 32], strides = [1, 1]} : vector<2x128xf32> to vector<2x32xf32>
    %231 = arith.negf %230 : vector<2x32xf32>
    %232 = math.exp %231 : vector<2x32xf32>
    %cst_65 = arith.constant 1.000000e+00 : f32
    %233 = vector.broadcast %cst_65 : f32 to vector<2x32xf32>
    %234 = arith.addf %233, %232 : vector<2x32xf32>
    %235 = arith.divf %233, %234 : vector<2x32xf32>
    %236 = arith.mulf %227, %209 : vector<2x32xf32>
    %237 = arith.mulf %221, %229 : vector<2x32xf32>
    %238 = arith.addf %236, %237 : vector<2x32xf32>
    %239 = math.tanh %238 : vector<2x32xf32>
    %240 = arith.mulf %235, %239 : vector<2x32xf32>
    %c14_66 = arith.constant 14 : index
    %c0_67 = arith.constant 0 : index
    %241 = vector.load %arg13[%c14_66, %c0_67] : memref<16x32xf32, #tpu.memory_space<vmem>>, vector<2x32xf32>
    tpu.vector_store %arg13[%c14_66, %c0_67], %240 {strides = array<i32>} : memref<16x32xf32, #tpu.memory_space<vmem>>, vector<2x32xf32>,
    %c0_68 = arith.constant 0 : index
    %c0_69 = arith.constant 0 : index
    %242 = vector.load %arg13[%c0_68, %c0_69] : memref<16x32xf32, #tpu.memory_space<vmem>>, vector<16x32xf32>
    %c0_70 = arith.constant 0 : index
    %c0_71 = arith.constant 0 : index
    %243 = vector.load %arg4[%c0_70, %c0_71] : memref<32x128xf32, #tpu.memory_space<vmem>>, vector<32x128xf32>
    %cst_72 = arith.constant dense<0.000000e+00> : vector<16x128xf32>
    %244 = tpu.matmul %242, %243, %cst_72 {dimension_numbers = #tpu.dot_dimension_numbers<[1], [0], [0], [1], [0, 0, 1, 1], [], []>} : vector<16x32xf32>, vector<32x128xf32>, vector<16x128xf32> -> vector<16x128xf32>
    %c0_73 = arith.constant 0 : index
    %c0_74 = arith.constant 0 : index
    %245 = vector.load %arg6[%c0_73, %c0_74] : memref<1x128xf32, #tpu.memory_space<vmem>>, vector<1x128xf32>
    %246 = vector.broadcast %245 : vector<1x128xf32> to vector<16x128xf32>
    %247 = arith.addf %244, %246 : vector<16x128xf32>
    %c0_75 = arith.constant 0 : index
    %c0_76 = arith.constant 0 : index
    %248 = vector.load %arg12[%c0_75, %c0_76] : memref<16x128xf32, #tpu.memory_space<vmem>>, vector<16x128xf32>
    tpu.vector_store %arg12[%c0_75, %c0_76], %247 {strides = array<i32>} : memref<16x128xf32, #tpu.memory_space<vmem>>, vector<16x128xf32>,
    %c0_77 = arith.constant 0 : index
    %c0_78 = arith.constant 0 : index
    %249 = vector.load %arg5[%c0_77, %c0_78] : memref<32x128xf32, #tpu.memory_space<vmem>>, vector<32x128xf32>
    %cst_79 = arith.constant 0.000000e+00 : f32
    %250 = vector.broadcast %cst_79 : f32 to vector<2x32xf32>
    %cst_80 = arith.constant 0.000000e+00 : f32
    %251 = vector.broadcast %cst_80 : f32 to vector<2x32xf32>
    %c0_81 = arith.constant 0 : index
    %c0_82 = arith.constant 0 : index
    %252 = vector.load %arg12[%c0_81, %c0_82] : memref<16x128xf32, #tpu.memory_space<vmem>>, vector<2x128xf32>
    %cst_83 = arith.constant dense<0.000000e+00> : vector<2x128xf32>
    %253 = tpu.matmul %250, %249, %cst_83 {dimension_numbers = #tpu.dot_dimension_numbers<[1], [0], [0], [1], [0, 0, 1, 1], [], []>} : vector<2x32xf32>, vector<32x128xf32>, vector<2x128xf32> -> vector<2x128xf32>
    %254 = arith.addf %252, %253 : vector<2x128xf32>
    %255 = vector.extract_strided_slice %254 {offsets = [0, 0], sizes = [2, 32], strides = [1, 1]} : vector<2x128xf32> to vector<2x32xf32>
    %256 = arith.negf %255 : vector<2x32xf32>
    %257 = math.exp %256 : vector<2x32xf32>
    %cst_84 = arith.constant 1.000000e+00 : f32
    %258 = vector.broadcast %cst_84 : f32 to vector<2x32xf32>
    %259 = arith.addf %258, %257 : vector<2x32xf32>
    %260 = arith.divf %258, %259 : vector<2x32xf32>
    %261 = vector.extract_strided_slice %254 {offsets = [0, 32], sizes = [2, 32], strides = [1, 1]} : vector<2x128xf32> to vector<2x32xf32>
    %262 = arith.negf %261 : vector<2x32xf32>
    %263 = math.exp %262 : vector<2x32xf32>
    %cst_85 = arith.constant 1.000000e+00 : f32
    %264 = vector.broadcast %cst_85 : f32 to vector<2x32xf32>
    %265 = arith.addf %264, %263 : vector<2x32xf32>
    %266 = arith.divf %264, %265 : vector<2x32xf32>
    %267 = vector.extract_strided_slice %254 {offsets = [0, 64], sizes = [2, 32], strides = [1, 1]} : vector<2x128xf32> to vector<2x32xf32>
    %268 = math.tanh %267 : vector<2x32xf32>
    %269 = vector.extract_strided_slice %254 {offsets = [0, 96], sizes = [2, 32], strides = [1, 1]} : vector<2x128xf32> to vector<2x32xf32>
    %270 = arith.negf %269 : vector<2x32xf32>
    %271 = math.exp %270 : vector<2x32xf32>
    %cst_86 = arith.constant 1.000000e+00 : f32
    %272 = vector.broadcast %cst_86 : f32 to vector<2x32xf32>
    %273 = arith.addf %272, %271 : vector<2x32xf32>
    %274 = arith.divf %272, %273 : vector<2x32xf32>
    %275 = arith.mulf %266, %251 : vector<2x32xf32>
    %276 = arith.mulf %260, %268 : vector<2x32xf32>
    %277 = arith.addf %275, %276 : vector<2x32xf32>
    %278 = math.tanh %277 : vector<2x32xf32>
    %279 = arith.mulf %274, %278 : vector<2x32xf32>
    %c2_87 = arith.constant 2 : index
    %c0_88 = arith.constant 0 : index
    %280 = vector.load %arg12[%c2_87, %c0_88] : memref<16x128xf32, #tpu.memory_space<vmem>>, vector<2x128xf32>
    %cst_89 = arith.constant dense<0.000000e+00> : vector<2x128xf32>
    %281 = tpu.matmul %279, %249, %cst_89 {dimension_numbers = #tpu.dot_dimension_numbers<[1], [0], [0], [1], [0, 0, 1, 1], [], []>} : vector<2x32xf32>, vector<32x128xf32>, vector<2x128xf32> -> vector<2x128xf32>
    %282 = arith.addf %280, %281 : vector<2x128xf32>
    %283 = vector.extract_strided_slice %282 {offsets = [0, 0], sizes = [2, 32], strides = [1, 1]} : vector<2x128xf32> to vector<2x32xf32>
    %284 = arith.negf %283 : vector<2x32xf32>
    %285 = math.exp %284 : vector<2x32xf32>
    %cst_90 = arith.constant 1.000000e+00 : f32
    %286 = vector.broadcast %cst_90 : f32 to vector<2x32xf32>
    %287 = arith.addf %286, %285 : vector<2x32xf32>
    %288 = arith.divf %286, %287 : vector<2x32xf32>
    %289 = vector.extract_strided_slice %282 {offsets = [0, 32], sizes = [2, 32], strides = [1, 1]} : vector<2x128xf32> to vector<2x32xf32>
    %290 = arith.negf %289 : vector<2x32xf32>
    %291 = math.exp %290 : vector<2x32xf32>
    %cst_91 = arith.constant 1.000000e+00 : f32
    %292 = vector.broadcast %cst_91 : f32 to vector<2x32xf32>
    %293 = arith.addf %292, %291 : vector<2x32xf32>
    %294 = arith.divf %292, %293 : vector<2x32xf32>
    %295 = vector.extract_strided_slice %282 {offsets = [0, 64], sizes = [2, 32], strides = [1, 1]} : vector<2x128xf32> to vector<2x32xf32>
    %296 = math.tanh %295 : vector<2x32xf32>
    %297 = vector.extract_strided_slice %282 {offsets = [0, 96], sizes = [2, 32], strides = [1, 1]} : vector<2x128xf32> to vector<2x32xf32>
    %298 = arith.negf %297 : vector<2x32xf32>
    %299 = math.exp %298 : vector<2x32xf32>
    %cst_92 = arith.constant 1.000000e+00 : f32
    %300 = vector.broadcast %cst_92 : f32 to vector<2x32xf32>
    %301 = arith.addf %300, %299 : vector<2x32xf32>
    %302 = arith.divf %300, %301 : vector<2x32xf32>
    %303 = arith.mulf %294, %277 : vector<2x32xf32>
    %304 = arith.mulf %288, %296 : vector<2x32xf32>
    %305 = arith.addf %303, %304 : vector<2x32xf32>
    %306 = math.tanh %305 : vector<2x32xf32>
    %307 = arith.mulf %302, %306 : vector<2x32xf32>
    %c4_93 = arith.constant 4 : index
    %c0_94 = arith.constant 0 : index
    %308 = vector.load %arg12[%c4_93, %c0_94] : memref<16x128xf32, #tpu.memory_space<vmem>>, vector<2x128xf32>
    %cst_95 = arith.constant dense<0.000000e+00> : vector<2x128xf32>
    %309 = tpu.matmul %307, %249, %cst_95 {dimension_numbers = #tpu.dot_dimension_numbers<[1], [0], [0], [1], [0, 0, 1, 1], [], []>} : vector<2x32xf32>, vector<32x128xf32>, vector<2x128xf32> -> vector<2x128xf32>
    %310 = arith.addf %308, %309 : vector<2x128xf32>
    %311 = vector.extract_strided_slice %310 {offsets = [0, 0], sizes = [2, 32], strides = [1, 1]} : vector<2x128xf32> to vector<2x32xf32>
    %312 = arith.negf %311 : vector<2x32xf32>
    %313 = math.exp %312 : vector<2x32xf32>
    %cst_96 = arith.constant 1.000000e+00 : f32
    %314 = vector.broadcast %cst_96 : f32 to vector<2x32xf32>
    %315 = arith.addf %314, %313 : vector<2x32xf32>
    %316 = arith.divf %314, %315 : vector<2x32xf32>
    %317 = vector.extract_strided_slice %310 {offsets = [0, 32], sizes = [2, 32], strides = [1, 1]} : vector<2x128xf32> to vector<2x32xf32>
    %318 = arith.negf %317 : vector<2x32xf32>
    %319 = math.exp %318 : vector<2x32xf32>
    %cst_97 = arith.constant 1.000000e+00 : f32
    %320 = vector.broadcast %cst_97 : f32 to vector<2x32xf32>
    %321 = arith.addf %320, %319 : vector<2x32xf32>
    %322 = arith.divf %320, %321 : vector<2x32xf32>
    %323 = vector.extract_strided_slice %310 {offsets = [0, 64], sizes = [2, 32], strides = [1, 1]} : vector<2x128xf32> to vector<2x32xf32>
    %324 = math.tanh %323 : vector<2x32xf32>
    %325 = vector.extract_strided_slice %310 {offsets = [0, 96], sizes = [2, 32], strides = [1, 1]} : vector<2x128xf32> to vector<2x32xf32>
    %326 = arith.negf %325 : vector<2x32xf32>
    %327 = math.exp %326 : vector<2x32xf32>
    %cst_98 = arith.constant 1.000000e+00 : f32
    %328 = vector.broadcast %cst_98 : f32 to vector<2x32xf32>
    %329 = arith.addf %328, %327 : vector<2x32xf32>
    %330 = arith.divf %328, %329 : vector<2x32xf32>
    %331 = arith.mulf %322, %305 : vector<2x32xf32>
    %332 = arith.mulf %316, %324 : vector<2x32xf32>
    %333 = arith.addf %331, %332 : vector<2x32xf32>
    %334 = math.tanh %333 : vector<2x32xf32>
    %335 = arith.mulf %330, %334 : vector<2x32xf32>
    %c6_99 = arith.constant 6 : index
    %c0_100 = arith.constant 0 : index
    %336 = vector.load %arg12[%c6_99, %c0_100] : memref<16x128xf32, #tpu.memory_space<vmem>>, vector<2x128xf32>
    %cst_101 = arith.constant dense<0.000000e+00> : vector<2x128xf32>
    %337 = tpu.matmul %335, %249, %cst_101 {dimension_numbers = #tpu.dot_dimension_numbers<[1], [0], [0], [1], [0, 0, 1, 1], [], []>} : vector<2x32xf32>, vector<32x128xf32>, vector<2x128xf32> -> vector<2x128xf32>
    %338 = arith.addf %336, %337 : vector<2x128xf32>
    %339 = vector.extract_strided_slice %338 {offsets = [0, 0], sizes = [2, 32], strides = [1, 1]} : vector<2x128xf32> to vector<2x32xf32>
    %340 = arith.negf %339 : vector<2x32xf32>
    %341 = math.exp %340 : vector<2x32xf32>
    %cst_102 = arith.constant 1.000000e+00 : f32
    %342 = vector.broadcast %cst_102 : f32 to vector<2x32xf32>
    %343 = arith.addf %342, %341 : vector<2x32xf32>
    %344 = arith.divf %342, %343 : vector<2x32xf32>
    %345 = vector.extract_strided_slice %338 {offsets = [0, 32], sizes = [2, 32], strides = [1, 1]} : vector<2x128xf32> to vector<2x32xf32>
    %346 = arith.negf %345 : vector<2x32xf32>
    %347 = math.exp %346 : vector<2x32xf32>
    %cst_103 = arith.constant 1.000000e+00 : f32
    %348 = vector.broadcast %cst_103 : f32 to vector<2x32xf32>
    %349 = arith.addf %348, %347 : vector<2x32xf32>
    %350 = arith.divf %348, %349 : vector<2x32xf32>
    %351 = vector.extract_strided_slice %338 {offsets = [0, 64], sizes = [2, 32], strides = [1, 1]} : vector<2x128xf32> to vector<2x32xf32>
    %352 = math.tanh %351 : vector<2x32xf32>
    %353 = vector.extract_strided_slice %338 {offsets = [0, 96], sizes = [2, 32], strides = [1, 1]} : vector<2x128xf32> to vector<2x32xf32>
    %354 = arith.negf %353 : vector<2x32xf32>
    %355 = math.exp %354 : vector<2x32xf32>
    %cst_104 = arith.constant 1.000000e+00 : f32
    %356 = vector.broadcast %cst_104 : f32 to vector<2x32xf32>
    %357 = arith.addf %356, %355 : vector<2x32xf32>
    %358 = arith.divf %356, %357 : vector<2x32xf32>
    %359 = arith.mulf %350, %333 : vector<2x32xf32>
    %360 = arith.mulf %344, %352 : vector<2x32xf32>
    %361 = arith.addf %359, %360 : vector<2x32xf32>
    %362 = math.tanh %361 : vector<2x32xf32>
    %363 = arith.mulf %358, %362 : vector<2x32xf32>
    %c8_105 = arith.constant 8 : index
    %c0_106 = arith.constant 0 : index
    %364 = vector.load %arg12[%c8_105, %c0_106] : memref<16x128xf32, #tpu.memory_space<vmem>>, vector<2x128xf32>
    %cst_107 = arith.constant dense<0.000000e+00> : vector<2x128xf32>
    %365 = tpu.matmul %363, %249, %cst_107 {dimension_numbers = #tpu.dot_dimension_numbers<[1], [0], [0], [1], [0, 0, 1, 1], [], []>} : vector<2x32xf32>, vector<32x128xf32>, vector<2x128xf32> -> vector<2x128xf32>
    %366 = arith.addf %364, %365 : vector<2x128xf32>
    %367 = vector.extract_strided_slice %366 {offsets = [0, 0], sizes = [2, 32], strides = [1, 1]} : vector<2x128xf32> to vector<2x32xf32>
    %368 = arith.negf %367 : vector<2x32xf32>
    %369 = math.exp %368 : vector<2x32xf32>
    %cst_108 = arith.constant 1.000000e+00 : f32
    %370 = vector.broadcast %cst_108 : f32 to vector<2x32xf32>
    %371 = arith.addf %370, %369 : vector<2x32xf32>
    %372 = arith.divf %370, %371 : vector<2x32xf32>
    %373 = vector.extract_strided_slice %366 {offsets = [0, 32], sizes = [2, 32], strides = [1, 1]} : vector<2x128xf32> to vector<2x32xf32>
    %374 = arith.negf %373 : vector<2x32xf32>
    %375 = math.exp %374 : vector<2x32xf32>
    %cst_109 = arith.constant 1.000000e+00 : f32
    %376 = vector.broadcast %cst_109 : f32 to vector<2x32xf32>
    %377 = arith.addf %376, %375 : vector<2x32xf32>
    %378 = arith.divf %376, %377 : vector<2x32xf32>
    %379 = vector.extract_strided_slice %366 {offsets = [0, 64], sizes = [2, 32], strides = [1, 1]} : vector<2x128xf32> to vector<2x32xf32>
    %380 = math.tanh %379 : vector<2x32xf32>
    %381 = vector.extract_strided_slice %366 {offsets = [0, 96], sizes = [2, 32], strides = [1, 1]} : vector<2x128xf32> to vector<2x32xf32>
    %382 = arith.negf %381 : vector<2x32xf32>
    %383 = math.exp %382 : vector<2x32xf32>
    %cst_110 = arith.constant 1.000000e+00 : f32
    %384 = vector.broadcast %cst_110 : f32 to vector<2x32xf32>
    %385 = arith.addf %384, %383 : vector<2x32xf32>
    %386 = arith.divf %384, %385 : vector<2x32xf32>
    %387 = arith.mulf %378, %361 : vector<2x32xf32>
    %388 = arith.mulf %372, %380 : vector<2x32xf32>
    %389 = arith.addf %387, %388 : vector<2x32xf32>
    %390 = math.tanh %389 : vector<2x32xf32>
    %391 = arith.mulf %386, %390 : vector<2x32xf32>
    %c10_111 = arith.constant 10 : index
    %c0_112 = arith.constant 0 : index
    %392 = vector.load %arg12[%c10_111, %c0_112] : memref<16x128xf32, #tpu.memory_space<vmem>>, vector<2x128xf32>
    %cst_113 = arith.constant dense<0.000000e+00> : vector<2x128xf32>
    %393 = tpu.matmul %391, %249, %cst_113 {dimension_numbers = #tpu.dot_dimension_numbers<[1], [0], [0], [1], [0, 0, 1, 1], [], []>} : vector<2x32xf32>, vector<32x128xf32>, vector<2x128xf32> -> vector<2x128xf32>
    %394 = arith.addf %392, %393 : vector<2x128xf32>
    %395 = vector.extract_strided_slice %394 {offsets = [0, 0], sizes = [2, 32], strides = [1, 1]} : vector<2x128xf32> to vector<2x32xf32>
    %396 = arith.negf %395 : vector<2x32xf32>
    %397 = math.exp %396 : vector<2x32xf32>
    %cst_114 = arith.constant 1.000000e+00 : f32
    %398 = vector.broadcast %cst_114 : f32 to vector<2x32xf32>
    %399 = arith.addf %398, %397 : vector<2x32xf32>
    %400 = arith.divf %398, %399 : vector<2x32xf32>
    %401 = vector.extract_strided_slice %394 {offsets = [0, 32], sizes = [2, 32], strides = [1, 1]} : vector<2x128xf32> to vector<2x32xf32>
    %402 = arith.negf %401 : vector<2x32xf32>
    %403 = math.exp %402 : vector<2x32xf32>
    %cst_115 = arith.constant 1.000000e+00 : f32
    %404 = vector.broadcast %cst_115 : f32 to vector<2x32xf32>
    %405 = arith.addf %404, %403 : vector<2x32xf32>
    %406 = arith.divf %404, %405 : vector<2x32xf32>
    %407 = vector.extract_strided_slice %394 {offsets = [0, 64], sizes = [2, 32], strides = [1, 1]} : vector<2x128xf32> to vector<2x32xf32>
    %408 = math.tanh %407 : vector<2x32xf32>
    %409 = vector.extract_strided_slice %394 {offsets = [0, 96], sizes = [2, 32], strides = [1, 1]} : vector<2x128xf32> to vector<2x32xf32>
    %410 = arith.negf %409 : vector<2x32xf32>
    %411 = math.exp %410 : vector<2x32xf32>
    %cst_116 = arith.constant 1.000000e+00 : f32
    %412 = vector.broadcast %cst_116 : f32 to vector<2x32xf32>
    %413 = arith.addf %412, %411 : vector<2x32xf32>
    %414 = arith.divf %412, %413 : vector<2x32xf32>
    %415 = arith.mulf %406, %389 : vector<2x32xf32>
    %416 = arith.mulf %400, %408 : vector<2x32xf32>
    %417 = arith.addf %415, %416 : vector<2x32xf32>
    %418 = math.tanh %417 : vector<2x32xf32>
    %419 = arith.mulf %414, %418 : vector<2x32xf32>
    %c12_117 = arith.constant 12 : index
    %c0_118 = arith.constant 0 : index
    %420 = vector.load %arg12[%c12_117, %c0_118] : memref<16x128xf32, #tpu.memory_space<vmem>>, vector<2x128xf32>
    %cst_119 = arith.constant dense<0.000000e+00> : vector<2x128xf32>
    %421 = tpu.matmul %419, %249, %cst_119 {dimension_numbers = #tpu.dot_dimension_numbers<[1], [0], [0], [1], [0, 0, 1, 1], [], []>} : vector<2x32xf32>, vector<32x128xf32>, vector<2x128xf32> -> vector<2x128xf32>
    %422 = arith.addf %420, %421 : vector<2x128xf32>
    %423 = vector.extract_strided_slice %422 {offsets = [0, 0], sizes = [2, 32], strides = [1, 1]} : vector<2x128xf32> to vector<2x32xf32>
    %424 = arith.negf %423 : vector<2x32xf32>
    %425 = math.exp %424 : vector<2x32xf32>
    %cst_120 = arith.constant 1.000000e+00 : f32
    %426 = vector.broadcast %cst_120 : f32 to vector<2x32xf32>
    %427 = arith.addf %426, %425 : vector<2x32xf32>
    %428 = arith.divf %426, %427 : vector<2x32xf32>
    %429 = vector.extract_strided_slice %422 {offsets = [0, 32], sizes = [2, 32], strides = [1, 1]} : vector<2x128xf32> to vector<2x32xf32>
    %430 = arith.negf %429 : vector<2x32xf32>
    %431 = math.exp %430 : vector<2x32xf32>
    %cst_121 = arith.constant 1.000000e+00 : f32
    %432 = vector.broadcast %cst_121 : f32 to vector<2x32xf32>
    %433 = arith.addf %432, %431 : vector<2x32xf32>
    %434 = arith.divf %432, %433 : vector<2x32xf32>
    %435 = vector.extract_strided_slice %422 {offsets = [0, 64], sizes = [2, 32], strides = [1, 1]} : vector<2x128xf32> to vector<2x32xf32>
    %436 = math.tanh %435 : vector<2x32xf32>
    %437 = vector.extract_strided_slice %422 {offsets = [0, 96], sizes = [2, 32], strides = [1, 1]} : vector<2x128xf32> to vector<2x32xf32>
    %438 = arith.negf %437 : vector<2x32xf32>
    %439 = math.exp %438 : vector<2x32xf32>
    %cst_122 = arith.constant 1.000000e+00 : f32
    %440 = vector.broadcast %cst_122 : f32 to vector<2x32xf32>
    %441 = arith.addf %440, %439 : vector<2x32xf32>
    %442 = arith.divf %440, %441 : vector<2x32xf32>
    %443 = arith.mulf %434, %417 : vector<2x32xf32>
    %444 = arith.mulf %428, %436 : vector<2x32xf32>
    %445 = arith.addf %443, %444 : vector<2x32xf32>
    %446 = math.tanh %445 : vector<2x32xf32>
    %447 = arith.mulf %442, %446 : vector<2x32xf32>
    %c14_123 = arith.constant 14 : index
    %c0_124 = arith.constant 0 : index
    %448 = vector.load %arg12[%c14_123, %c0_124] : memref<16x128xf32, #tpu.memory_space<vmem>>, vector<2x128xf32>
    %cst_125 = arith.constant dense<0.000000e+00> : vector<2x128xf32>
    %449 = tpu.matmul %447, %249, %cst_125 {dimension_numbers = #tpu.dot_dimension_numbers<[1], [0], [0], [1], [0, 0, 1, 1], [], []>} : vector<2x32xf32>, vector<32x128xf32>, vector<2x128xf32> -> vector<2x128xf32>
    %450 = arith.addf %448, %449 : vector<2x128xf32>
    %451 = vector.extract_strided_slice %450 {offsets = [0, 0], sizes = [2, 32], strides = [1, 1]} : vector<2x128xf32> to vector<2x32xf32>
    %452 = arith.negf %451 : vector<2x32xf32>
    %453 = math.exp %452 : vector<2x32xf32>
    %cst_126 = arith.constant 1.000000e+00 : f32
    %454 = vector.broadcast %cst_126 : f32 to vector<2x32xf32>
    %455 = arith.addf %454, %453 : vector<2x32xf32>
    %456 = arith.divf %454, %455 : vector<2x32xf32>
    %457 = vector.extract_strided_slice %450 {offsets = [0, 32], sizes = [2, 32], strides = [1, 1]} : vector<2x128xf32> to vector<2x32xf32>
    %458 = arith.negf %457 : vector<2x32xf32>
    %459 = math.exp %458 : vector<2x32xf32>
    %cst_127 = arith.constant 1.000000e+00 : f32
    %460 = vector.broadcast %cst_127 : f32 to vector<2x32xf32>
    %461 = arith.addf %460, %459 : vector<2x32xf32>
    %462 = arith.divf %460, %461 : vector<2x32xf32>
    %463 = vector.extract_strided_slice %450 {offsets = [0, 64], sizes = [2, 32], strides = [1, 1]} : vector<2x128xf32> to vector<2x32xf32>
    %464 = math.tanh %463 : vector<2x32xf32>
    %465 = vector.extract_strided_slice %450 {offsets = [0, 96], sizes = [2, 32], strides = [1, 1]} : vector<2x128xf32> to vector<2x32xf32>
    %466 = arith.negf %465 : vector<2x32xf32>
    %467 = math.exp %466 : vector<2x32xf32>
    %cst_128 = arith.constant 1.000000e+00 : f32
    %468 = vector.broadcast %cst_128 : f32 to vector<2x32xf32>
    %469 = arith.addf %468, %467 : vector<2x32xf32>
    %470 = arith.divf %468, %469 : vector<2x32xf32>
    %471 = arith.mulf %462, %445 : vector<2x32xf32>
    %472 = arith.mulf %456, %464 : vector<2x32xf32>
    %473 = arith.addf %471, %472 : vector<2x32xf32>
    %474 = math.tanh %473 : vector<2x32xf32>
    %475 = arith.mulf %470, %474 : vector<2x32xf32>
    %c0_129 = arith.constant 0 : index
    %c0_130 = arith.constant 0 : index
    %476 = vector.load %arg7[%c0_129, %c0_130] : memref<32x32xf32, #tpu.memory_space<vmem>>, vector<32x32xf32>
    %cst_131 = arith.constant dense<0.000000e+00> : vector<2x32xf32>
    %477 = tpu.matmul %475, %476, %cst_131 {dimension_numbers = #tpu.dot_dimension_numbers<[1], [0], [0], [1], [0, 0, 1, 1], [], []>} : vector<2x32xf32>, vector<32x32xf32>, vector<2x32xf32> -> vector<2x32xf32>
    %c0_132 = arith.constant 0 : index
    %c0_133 = arith.constant 0 : index
    %478 = vector.load %arg8[%c0_132, %c0_133] : memref<1x32xf32, #tpu.memory_space<vmem>>, vector<1x32xf32>
    %479 = vector.broadcast %478 : vector<1x32xf32> to vector<2x32xf32>
    %480 = arith.addf %477, %479 : vector<2x32xf32>
    %cst_134 = arith.constant 0.000000e+00 : f32
    %481 = vector.broadcast %cst_134 : f32 to vector<2x32xf32>
    %482 = arith.maximumf %480, %481 : vector<2x32xf32>
    %c0_135 = arith.constant 0 : index
    %c0_136 = arith.constant 0 : index
    %483 = vector.load %arg9[%c0_135, %c0_136] : memref<1x32xf32, #tpu.memory_space<vmem>>, vector<1x32xf32>
    %484 = vector.broadcast %483 : vector<1x32xf32> to vector<2x32xf32>
    %485 = arith.mulf %482, %484 : vector<2x32xf32>
    %cst_137 = arith.constant dense<0.000000e+00> : vector<2xf32>
    %486 = vector.multi_reduction <add>, %485, %cst_137 [1] : vector<2x32xf32> to vector<2xf32>
    %487 = vector.shape_cast %486 : vector<2xf32> to vector<2x1xf32>
    %c0_138 = arith.constant 0 : index
    %c0_139 = arith.constant 0 : index
    %488 = vector.load %arg10[%c0_138, %c0_139] : memref<1x1xf32, #tpu.memory_space<vmem>>, vector<1x1xf32>
    %489 = vector.broadcast %488 : vector<1x1xf32> to vector<2x1xf32>
    %490 = arith.addf %487, %489 : vector<2x1xf32>
    %c0_140 = arith.constant 0 : index
    %c0_141 = arith.constant 0 : index
    %491 = vector.load %arg11[%c0_140, %c0_141] : memref<2x1xf32, #tpu.memory_space<vmem>>, vector<2x1xf32>
    tpu.vector_store %arg11[%c0_140, %c0_141], %490 {strides = array<i32>} : memref<2x1xf32, #tpu.memory_space<vmem>>, vector<2x1xf32>,
    return
  }
}

</mosaic_0001>

<bundles_post_ra>
// kernel: tpu_custom_call.1
= control target key start
LH: loop header
LB: loop body
LE: loop exit
PB: predicated region body
PF: predicated region fallthrough
CT: control target
= control target key end

     0   :  { %s3206_s0 = inlined_call_operand.hbm [shape: f32[16,16], index: 0, kind: input, shape index: {}]   ;;  %s3207_s1 = inlined_call_operand.hbm [shape: f32[16,128], index: 1, kind: input, shape index: {}]   ;;  %s3208_s2 = inlined_call_operand.hbm [shape: f32[32,128], index: 2, kind: input, shape index: {}]   ;;  %s3209_s3 = inlined_call_operand.vmem [shape: f32[1,128], index: 3, kind: input, shape index: {}]   ;;  %s3210_s4 = inlined_call_operand.hbm [shape: f32[32,128], index: 4, kind: input, shape index: {}]   ;;  %s3211_s5 = inlined_call_operand.hbm [shape: f32[32,128], index: 5, kind: input, shape index: {}]   ;;  %s3212_s6 = inlined_call_operand.vmem [shape: f32[1,128], index: 6, kind: input, shape index: {}]   ;;  %s3213_s7 = inlined_call_operand.hbm [shape: f32[32,32], index: 7, kind: input, shape index: {}]   ;;  %s3214_s8 = inlined_call_operand.vmem [shape: f32[1,32], index: 8, kind: input, shape index: {}]   ;;  %s3215_s9 = inlined_call_operand.vmem [shape: f32[1,32], index: 9, kind: input, shape index: {}]   ;;  %s3216_s10 = inlined_call_operand.<no memory space> [shape: f32[1,1], index: 10, kind: input, shape index: {}]   ;;  %s3217_s11 = inlined_call_operand.vmem [shape: f32[2,1], index: 11, kind: output, shape index: {}]  }
   0x1   :  { %v16_v0 = vstv %s3216_s10 }
   0x2   :  { %17 = vst [vmem:[#allocation4] sm:$0x1] %v16_v0 }
   0x3   :  { %18 = vsyncpa [#allocation6], 0 }
   0x4   :  { %19 = vsyncpa [#allocation8], 0 }
   0x5   :  { %20 = vsyncpa [#allocation11], 0 }
   0x6   :  { %21 = vsyncpa [#allocation14], 0  ;;  %s2802_s19 = smov [#allocation7]   ;;  %s2803_s21 = smov [#allocation10]  }
   0x7   :  { %s39_s20 = sshll.u32 %s2802_s19, 4  ;;  %s65_s22 = sshll.u32 %s2803_s21, 4  ;;  %s40_s20 = int_to_ptr.vmem [resolvable:$true] %s39_s20  ;;  %s2878_s22 = int_to_ptr.vmem [resolvable:$true] %s65_s22 }
   0x8   :  { %s2662_s25 = scalar_lea.hbm %s3207_s1, 256 }
   0x9   :  { %p2663_p0 = scmp.ne.s32.totalorder %s3207_s1, %s2662_s25  ;;  %p2666_p1 = scmp.lt.u32.totalorder %s2662_s25, %s3207_s1 }
   0xb   :  { %p2668_p2 = pnand %p2666_p1, %p2663_p0 }
   0xd   :  { %2671 = shalt.err (!%p2668_p2)
}
   0xe   :  { %s2672_s29 = scalar_lea.vmem %s40_s20, 256  ;;  %p2677_p4 = scmp.lt.s32.totalorder %s40_s20, %s40_s20 }
   0xf   :  { %p2673_p3 = scmp.ne.s32.totalorder %s40_s20, %s2672_s29  ;;  %p2678_p5 = scmp.lt.s32.totalorder %s2672_s29, %s2672_s29 }
  0x11   :  { %p2679_p6 = por %p2678_p5, %p2677_p4 }
  0x13   :  { %p2680_p7 = pnand %p2679_p6, %p2673_p3 }
  0x15   :  { %2683 = shalt.err (!%p2680_p7)
}
  0x16   :  { %s2804_s30 = smov 128   ;;  %s2805_s12 = smov 8  }
  0x17   :  { %45 = dma.hbm_to_vmem [thread:$0]  %s3207_s1, 256, %s40_s20, [#allocation8], %s2804_s30, %s2804_s30, %s2805_s12  }
  0x18   :  { %s2684_s17 = scalar_lea.hbm %s3210_s4, 512 }
  0x19   :  { %p2685_p8 = scmp.ne.s32.totalorder %s3210_s4, %s2684_s17  ;;  %p2688_p9 = scmp.lt.u32.totalorder %s2684_s17, %s3210_s4 }
  0x1b   :  { %p2690_p10 = pnand %p2688_p9, %p2685_p8 }
  0x1d   :  { %2693 = shalt.err (!%p2690_p10)
}
  0x1e   :  { %s2694_s24 = scalar_lea.vmem %s2878_s22, 512  ;;  %p2699_p12 = scmp.lt.s32.totalorder %s2878_s22, %s2878_s22 }
  0x1f   :  { %p2695_p11 = scmp.ne.s32.totalorder %s2878_s22, %s2694_s24  ;;  %p2700_p13 = scmp.lt.s32.totalorder %s2694_s24, %s2694_s24 }
  0x21   :  { %p2701_p0 = por %p2700_p13, %p2699_p12 }
  0x23   :  { %p2702_p1 = pnand %p2701_p0, %p2695_p11 }
  0x25   :  { %2705 = shalt.err (!%p2702_p1)
}
  0x26   :  { %71 = dma.hbm_to_vmem [thread:$0]  %s3210_s4, 512, %s2878_s22, [#allocation11], %s2804_s30, %s2804_s30, %s2805_s12  }
  0x27   :  { %s2806_s25 = smov [#allocation5]   ;;  %s2807_s27 = smov [#allocation9]  }
  0x28   :  { %s27_s26 = sshll.u32 %s2806_s25, 4  ;;  %s51_s10 = sshll.u32 %s2807_s27, 4  ;;  %s28_s26 = int_to_ptr.vmem [resolvable:$true] %s27_s26  ;;  %s2915_s10 = int_to_ptr.vmem [resolvable:$true] %s51_s10 }
  0x29   :  { %s2706_s13 = scalar_lea.hbm %s3206_s0, 256 }
  0x2a   :  { %p2707_p2 = scmp.ne.s32.totalorder %s3206_s0, %s2706_s13  ;;  %p2710_p3 = scmp.lt.u32.totalorder %s2706_s13, %s3206_s0 }
  0x2c   :  { %p2712_p4 = pnand %p2710_p3, %p2707_p2 }
  0x2e   :  { %2715 = shalt.err (!%p2712_p4)
}
  0x2f   :  { %s2716_s4 = scalar_lea.vmem %s28_s26, 256  ;;  %p2721_p6 = scmp.lt.s32.totalorder %s28_s26, %s28_s26 }
  0x30   :  { %p2717_p5 = scmp.ne.s32.totalorder %s28_s26, %s2716_s4  ;;  %p2722_p7 = scmp.lt.s32.totalorder %s2716_s4, %s2716_s4 }
  0x32   :  { %p2723_p8 = por %p2722_p7, %p2721_p6 }
  0x34   :  { %p2724_p9 = pnand %p2723_p8, %p2717_p5 }
  0x36   :  { %2727 = shalt.err (!%p2724_p9)
}
  0x37   :  { %33 = dma.hbm_to_vmem [thread:$0]  %s3206_s0, 256, %s28_s26, [#allocation6], %s2804_s30, %s2804_s30, %s2805_s12  }
  0x38   :  { %s2728_s23 = scalar_lea.hbm %s3208_s2, 512 }
  0x39   :  { %p2729_p10 = scmp.ne.s32.totalorder %s3208_s2, %s2728_s23  ;;  %p2732_p11 = scmp.lt.u32.totalorder %s2728_s23, %s3208_s2 }
  0x3b   :  { %p2734_p12 = pnand %p2732_p11, %p2729_p10 }
  0x3d   :  { %2737 = shalt.err (!%p2734_p12)
}
  0x3e   :  { %s2738_s27 = scalar_lea.vmem %s2915_s10, 512  ;;  %p2743_p0 = scmp.lt.s32.totalorder %s2915_s10, %s2915_s10 }
  0x3f   :  { %p2739_p13 = scmp.ne.s32.totalorder %s2915_s10, %s2738_s27  ;;  %p2744_p1 = scmp.lt.s32.totalorder %s2738_s27, %s2738_s27 }
  0x41   :  { %p2745_p2 = por %p2744_p1, %p2743_p0 }
  0x43   :  { %p2746_p3 = pnand %p2745_p2, %p2739_p13 }
  0x45   :  { %2749 = shalt.err (!%p2746_p3)
}
  0x46   :  { %57 = dma.hbm_to_vmem [thread:$0]  %s3208_s2, 512, %s2915_s10, [#allocation8], %s2804_s30, %s2804_s30, %s2805_s12  }
  0x47   :  { %s2808_s28 = smov [#allocation12]   ;;  %s2809_s13 = smov [#allocation13]  }
  0x48   :  { %s77_s29 = sshll.u32 %s2808_s28, 4  ;;  %s91_s14 = sshll.u32 %s2809_s13, 4  ;;  %s78_s29 = int_to_ptr.vmem [resolvable:$true] %s77_s29  ;;  %s2952_s14 = int_to_ptr.vmem [resolvable:$true] %s91_s14 }
  0x49   :  { %s2750_s17 = scalar_lea.hbm %s3211_s5, 512 }
  0x4a   :  { %p2751_p4 = scmp.ne.s32.totalorder %s3211_s5, %s2750_s17  ;;  %p2754_p5 = scmp.lt.u32.totalorder %s2750_s17, %s3211_s5 }
  0x4c   :  { %p2756_p6 = pnand %p2754_p5, %p2751_p4 }
  0x4e   :  { %2759 = shalt.err (!%p2756_p6)
}
  0x4f   :  { %s2760_s2 = scalar_lea.vmem %s78_s29, 512  ;;  %p2765_p8 = scmp.lt.s32.totalorder %s78_s29, %s78_s29 }
  0x50   :  { %p2761_p7 = scmp.ne.s32.totalorder %s78_s29, %s2760_s2  ;;  %p2766_p9 = scmp.lt.s32.totalorder %s2760_s2, %s2760_s2 }
  0x52   :  { %p2767_p10 = por %p2766_p9, %p2765_p8 }
  0x54   :  { %p2768_p11 = pnand %p2767_p10, %p2761_p7 }
  0x56   :  { %2771 = shalt.err (!%p2768_p11)
}
  0x57   :  { %83 = dma.hbm_to_vmem [thread:$0]  %s3211_s5, 512, %s78_s29, [#allocation11], %s2804_s30, %s2804_s30, %s2805_s12  }
  0x58   :  { %s2772_s1 = scalar_lea.hbm %s3213_s7, 512 }
  0x59   :  { %p2773_p12 = scmp.ne.s32.totalorder %s3213_s7, %s2772_s1  ;;  %p2776_p13 = scmp.lt.u32.totalorder %s2772_s1, %s3213_s7 }
  0x5b   :  { %p2778_p0 = pnand %p2776_p13, %p2773_p12 }
  0x5d   :  { %2781 = shalt.err (!%p2778_p0)
}
  0x5e   :  { %s2782_s26 = scalar_lea.vmem %s2952_s14, 512  ;;  %p2787_p2 = scmp.lt.s32.totalorder %s2952_s14, %s2952_s14 }
  0x5f   :  { %p2783_p1 = scmp.ne.s32.totalorder %s2952_s14, %s2782_s26  ;;  %p2788_p3 = scmp.lt.s32.totalorder %s2782_s26, %s2782_s26 }
  0x61   :  { %p2789_p4 = por %p2788_p3, %p2787_p2 }
  0x63   :  { %p2790_p5 = pnand %p2789_p4, %p2783_p1 }
  0x65   :  { %2793 = shalt.err (!%p2790_p5)
}
  0x66   :  { %97 = dma.hbm_to_vmem [thread:$0]  %s3213_s7, 512, %s2952_s14, [#allocation14], %s2804_s30, %s2804_s30, %s2805_s12  }
  0x67   :  { %2794 = dma.done.wait [#allocation6], 256  }
  0x68   :  { %2795 = vsyncadd [#allocation6], 4294967040 }
  0x69   :  { %2796 = dma.done.wait [#allocation8], 768  }
  0x6a   :  { %2797 = vsyncadd [#allocation8], 4294966528 }
  0x6b   :  { %2798 = dma.done.wait [#allocation11], 1024  }
  0x6c   :  { %2799 = vsyncadd [#allocation11], 4294966272 }
  0x6d   :  { %2800 = dma.done.wait [#allocation14], 512  }
  0x6e   :  { %2801 = vsyncadd [#allocation14], 4294966784  ;;  %v2810_v1 = vmov 0.0|0.0   ;;  %vm2811_vm0 = vmmov 0   ;;  %v2812_v2 = vmov 0.0   ;;  %vm133_vm1 = vcmask 130048  }
  0x6f   :  { %2411 = vmatprep.subr.bf16.mxu1 %v2810_v1  ;;  %2217 = vmatprep.mubr.msk.f32.mxu1 %vm2811_vm0, %v2812_v2  ;;  %v124_v3 = vld [vmem:[#allocation7] sm:$0xff]  ;;  %v125_v4 = vld [vmem:[#allocation7 + $0x8] sm:$0xff]  ;;  %v122_v5 = vld [vmem:[#allocation5] sm:$0xff]  ;;  %s2813_s12 = smov 64   ;;  %vm325_vm2 = vcmask 254976   ;;  %vm222_vm3 = vcmask 261120  }
  0x70   :  { %v2407_v6 = vpack.c.bf16 %v125_v4, %v124_v3  ;;  %2206 = vmatprep.mubr.msk.f32.mxu0 %vm133_vm1, %v122_v5  ;;  %v217_v7 = vld [vmem:[#allocation9] sm:$0xff]  ;;  %v218_v8 = vld [vmem:[#allocation9 + $0x8] sm:$0xff]  ;;  %v219_v10 = vld [vmem:[#allocation9 + $0x10] sm:$0xff]  ;;  %vm2057_vm4 = vcmask 1024  }
  0x71   :  { %v2993_v9 = vpack.c.bf16 %v218_v8, %v217_v7  ;;  %v220_v11 = vld [vmem:[#allocation9 + $0x18] sm:$0xff]  ;;  %v123_v12 = vld [vmem:[#allocation5 + $0x8] sm:$0xff] }
  0x72   :  { %2408 = vmatprep.subr.bf16.mxu0 %v2407_v6  ;;  %v2996_v13 = vpack.c.bf16 %v220_v11, %v219_v10  ;;  %v2067_v14 = vld [vmem:[%s3209_s3] ss:$0 sm:$0xff]  ;;  %s2814_s3 = smov 32  }
  0x73   :  { %2410 = vmatpush3.bf16.msra.mxu0 %v2407_v6  ;;  %2413 = vmatpush3.bf16.msra.mxu1 %v2993_v9 }
  0x74   :  { %2414 = vmatprep.subr.bf16.mxu1 %v2810_v1  ;;  %2417 = vmatprep.subr.bf16.mxu0 %v2810_v1 }
  0x76   :  { %2207 = vmatmul.mubr.msk.f32.vlgmr.msra.gmra.mrb[0].mxu0 %vm133_vm1, %v123_v12 }
  0x77   :  { %2416 = vmatpush3.bf16.msra.mxu1 %v2996_v13  ;;  %2419 = vmatpush3.bf16.msra.mxu0 %v2993_v9 }
  0x78   :  { %2420 = vmatprep.subr.bf16.mxu0 %v2810_v1  ;;  %2228 = vmatprep.mubr.msk.f32.mxu0 %vm2811_vm0, %v2812_v2 }
  0x79   :  { %2423 = vmatprep.subr.bf16.mxu1 %v2810_v1 }
  0x7a   :  { %2218 = vmatmul.mubr.f32.vlgmr.msra.gmra.mrb[0].mxu1 %v2812_v2 }
  0x7b   :  { %2422 = vmatpush3.bf16.msra.mxu0 %v2996_v13  ;;  %2425 = vmatpush3.bf16.msra.mxu1 %v2993_v9 }
  0x7c   :  { %2426 = vmatprep.subr.bf16.mxu1 %v2810_v1  ;;  %2239 = vmatprep.mubr.msk.f32.mxu1 %vm2811_vm0, %v2812_v2 }
  0x7d   :  { %2429 = vmatprep.subr.bf16.mxu0 %v2810_v1 }
  0x7f   :  { %2428 = vmatpush3.bf16.msra.mxu1 %v2996_v13 }
  0x80   :  { %2435 = vmatprep.subr.bf16.mxu1 %v2810_v1 }
 0x149   :  { %v2208_v15 = vpop.f32.mrb[0].mxu0 }
 0x14a   :  { %v212_v16 = vadd.f32 %v2208_v15, %v2067_v14  ;;  %v206_v17 = vpop.f32.mrb[1].mxu0 }
 0x14b   :  { %v207_v18 = vadd.f32 %v2067_v14, %v206_v17 }
 0x14c   :  { %216 = vst [vmem:[#allocation2 + $0x8] sm:$0xff] %v212_v16 }
 0x14d   :  { %215 = vst [vmem:[#allocation2] sm:$0xff] %v207_v18  ;;  %v292_v19 = vpop.f32.mrb[0].mxu1 }
 0x14e   :  { %v2219_v20 = vpop.f32.mrb[1].mxu1 }
 0x154   :  { %v221_v21 = vld [vmem:[#allocation2] sm:$0x3]  ;;  %v327_v37 = vld [vmem:[#allocation2 + $0x2] sm:$0x3]  ;;  %v430_v55 = vld [vmem:[#allocation2 + $0x4] sm:$0x3] }
 0x155   :  { %v296_v22 = vadd.f32 %v292_v19, %v221_v21  ;;  %v533_v12 = vld [vmem:[#allocation2 + $0x6] sm:$0x3] }
 0x157   :  { %2534 = vtanh.f32 %v296_v22  ;;  %v2070_v24 = vmul.f32 -1.442695, %v296_v22 }
 0x159   :  { %2536 = vpow2.f32 %v2070_v24 }
 0x161   :  { %v2535_v23 = vpop.eup %2534 }
 0x162   :  { %306 = vrot.lane.b32.xlu0 %v2535_v23, %s2813_s12 }
 0x163   :  { %v2537_v25 = vpop.eup %2536 }
 0x164   :  { %v300_v26 = vadd.f32 1.0, %v2537_v25 }
 0x166   :  { %2538 = vrcp.f32 %v300_v26 }
 0x170   :  { %v2539_v27 = vpop.eup %2538 }
 0x171   :  { %v304_v30 = vmul.f32 0.0, %v2539_v27 }
 0x1d4   :  { %v307_v28 = vpop.permute.xlu0 %306 }
 0x1d5   :  { %v309_v29 = vmul.f32 %v2539_v27, %v307_v28 }
 0x1d7   :  { %311 = vrot.lane.b32.xlu0 %v309_v29, %s2814_s3 }
 0x249   :  { %v312_v31 = vpop.permute.xlu0 %311 }
 0x24a   :  { %v314_v32 = vadd.f32 %v312_v31, %v304_v30  ;;  %v636_v31 = vld [vmem:[#allocation2 + $0x8] sm:$0x3] }
 0x24c   :  { %2540 = vtanh.f32 %v314_v32 }
 0x256   :  { %v2541_v33 = vpop.eup %2540 }
 0x257   :  { %317 = vrot.lane.b32.xlu1 %v2541_v33, %s2813_s12 }
 0x2c9   :  { %v318_v34 = vpop.permute.xlu1 %317 }
 0x2ca   :  { %v320_v35 = vmul.f32 %v2539_v27, %v318_v34 }
 0x2cc   :  { %322 = vrot.lane.b32.xlu1 %v320_v35, %s2814_s3 }
 0x33e   :  { %v323_v36 = vpop.permute.xlu1 %322 }
 0x33f   :  { %326 = vst.msk [vmem:[#allocation3] sm:$0x3] %vm325_vm2, %v323_v36  ;;  %2229 = vmatmul.mubr.msk.f32.vlgmr.msra.gmra.mrb[2].mxu0 %vm222_vm3, %v323_v36 }
 0x340   :  { %2431 = vmatpush3.bf16.msra.mxu0 %v2993_v9  ;;  %2250 = vmatprep.mubr.msk.f32.mxu0 %vm2811_vm0, %v2812_v2 }
 0x341   :  { %2432 = vmatprep.subr.bf16.mxu0 %v2810_v1 }
 0x344   :  { %2434 = vmatpush3.bf16.msra.mxu0 %v2996_v13 }
 0x345   :  { %2441 = vmatprep.subr.bf16.mxu0 %v2810_v1 }
 0x412   :  { %v396_v38 = vpop.f32.mrb[2].mxu0 }
 0x413   :  { %v400_v39 = vadd.f32 %v396_v38, %v327_v37  ;;  %v2230_v40 = vpop.f32.mrb[3].mxu0 }
 0x415   :  { %2542 = vtanh.f32 %v400_v39  ;;  %v2072_v42 = vmul.f32 -1.442695, %v400_v39 }
 0x417   :  { %2544 = vpow2.f32 %v2072_v42 }
 0x41f   :  { %v2543_v41 = vpop.eup %2542 }
 0x420   :  { %410 = vrot.lane.b32.xlu0 %v2543_v41, %s2813_s12 }
 0x421   :  { %v2545_v43 = vpop.eup %2544 }
 0x422   :  { %v404_v44 = vadd.f32 1.0, %v2545_v43 }
 0x424   :  { %2546 = vrcp.f32 %v404_v44 }
 0x42e   :  { %v2547_v45 = vpop.eup %2546 }
 0x42f   :  { %v408_v48 = vmul.f32 %v2547_v45, %v314_v32 }
 0x492   :  { %v411_v46 = vpop.permute.xlu0 %410 }
 0x493   :  { %v413_v47 = vmul.f32 %v2547_v45, %v411_v46 }
 0x495   :  { %415 = vrot.lane.b32.xlu1 %v413_v47, %s2814_s3 }
 0x507   :  { %v416_v49 = vpop.permute.xlu1 %415 }
 0x508   :  { %v418_v50 = vadd.f32 %v416_v49, %v408_v48  ;;  %v739_v49 = vld [vmem:[#allocation2 + $0xa] sm:$0x3] }
 0x50a   :  { %2548 = vtanh.f32 %v418_v50 }
 0x514   :  { %v2549_v51 = vpop.eup %2548 }
 0x515   :  { %421 = vrot.lane.b32.xlu0 %v2549_v51, %s2813_s12 }
 0x587   :  { %v422_v52 = vpop.permute.xlu0 %421 }
 0x588   :  { %v424_v53 = vmul.f32 %v2547_v45, %v422_v52 }
 0x58a   :  { %426 = vrot.lane.b32.xlu1 %v424_v53, %s2814_s3 }
 0x5fc   :  { %v427_v54 = vpop.permute.xlu1 %426 }
 0x5fd   :  { %429 = vst.msk [vmem:[#allocation3 + $0x2] sm:$0x3] %vm325_vm2, %v427_v54  ;;  %2240 = vmatmul.mubr.msk.f32.vlgmr.msra.gmra.mrb[2].mxu1 %vm222_vm3, %v427_v54 }
 0x5fe   :  { %2437 = vmatpush3.bf16.msra.mxu1 %v2993_v9  ;;  %2261 = vmatprep.mubr.msk.f32.mxu1 %vm2811_vm0, %v2812_v2 }
 0x5ff   :  { %2438 = vmatprep.subr.bf16.mxu1 %v2810_v1 }
 0x602   :  { %2440 = vmatpush3.bf16.msra.mxu1 %v2996_v13 }
 0x603   :  { %2447 = vmatprep.subr.bf16.mxu1 %v2810_v1 }
 0x6d0   :  { %v499_v56 = vpop.f32.mrb[2].mxu1 }
 0x6d1   :  { %v503_v57 = vadd.f32 %v499_v56, %v430_v55  ;;  %v2241_v58 = vpop.f32.mrb[3].mxu1 }
 0x6d3   :  { %2550 = vtanh.f32 %v503_v57  ;;  %v2074_v60 = vmul.f32 -1.442695, %v503_v57 }
 0x6d5   :  { %2552 = vpow2.f32 %v2074_v60 }
 0x6dd   :  { %v2551_v59 = vpop.eup %2550 }
 0x6de   :  { %513 = vrot.lane.b32.xlu0 %v2551_v59, %s2813_s12 }
 0x6df   :  { %v2553_v61 = vpop.eup %2552 }
 0x6e0   :  { %v507_v62 = vadd.f32 1.0, %v2553_v61 }
 0x6e2   :  { %2554 = vrcp.f32 %v507_v62 }
 0x6ec   :  { %v2555_v63 = vpop.eup %2554 }
 0x6ed   :  { %v511_v4 = vmul.f32 %v2555_v63, %v418_v50 }
 0x750   :  { %v514_v0 = vpop.permute.xlu0 %513 }
 0x751   :  { %v516_v3 = vmul.f32 %v2555_v63, %v514_v0 }
 0x753   :  { %518 = vrot.lane.b32.xlu1 %v516_v3, %s2814_s3 }
 0x7c5   :  { %v519_v5 = vpop.permute.xlu1 %518 }
 0x7c6   :  { %v521_v6 = vadd.f32 %v519_v5, %v511_v4  ;;  %v842_v4 = vld [vmem:[#allocation2 + $0xc] sm:$0x3] }
 0x7c8   :  { %2556 = vtanh.f32 %v521_v6 }
 0x7d2   :  { %v2557_v7 = vpop.eup %2556 }
 0x7d3   :  { %524 = vrot.lane.b32.xlu0 %v2557_v7, %s2813_s12 }
 0x845   :  { %v525_v8 = vpop.permute.xlu0 %524 }
 0x846   :  { %v527_v10 = vmul.f32 %v2555_v63, %v525_v8 }
 0x848   :  { %529 = vrot.lane.b32.xlu1 %v527_v10, %s2814_s3 }
 0x8ba   :  { %v530_v11 = vpop.permute.xlu1 %529 }
 0x8bb   :  { %532 = vst.msk [vmem:[#allocation3 + $0x4] sm:$0x3] %vm325_vm2, %v530_v11  ;;  %2251 = vmatmul.mubr.msk.f32.vlgmr.msra.gmra.mrb[4].mxu0 %vm222_vm3, %v530_v11 }
 0x8bc   :  { %2443 = vmatpush3.bf16.msra.mxu0 %v2993_v9  ;;  %2272 = vmatprep.mubr.msk.f32.mxu0 %vm2811_vm0, %v2812_v2 }
 0x8bd   :  { %2444 = vmatprep.subr.bf16.mxu0 %v2810_v1 }
 0x8c0   :  { %2446 = vmatpush3.bf16.msra.mxu0 %v2996_v13 }
 0x8c1   :  { %2453 = vmatprep.subr.bf16.mxu0 %v2810_v1 }
 0x98e   :  { %v602_v14 = vpop.f32.mrb[4].mxu0 }
 0x98f   :  { %v606_v15 = vadd.f32 %v602_v14, %v533_v12  ;;  %v2252_v16 = vpop.f32.mrb[5].mxu0 }
 0x991   :  { %2558 = vtanh.f32 %v606_v15  ;;  %v2076_v18 = vmul.f32 -1.442695, %v606_v15 }
 0x993   :  { %2560 = vpow2.f32 %v2076_v18 }
 0x99b   :  { %v2559_v17 = vpop.eup %2558 }
 0x99c   :  { %616 = vrot.lane.b32.xlu0 %v2559_v17, %s2813_s12 }
 0x99d   :  { %v2561_v19 = vpop.eup %2560 }
 0x99e   :  { %v610_v20 = vadd.f32 1.0, %v2561_v19 }
 0x9a0   :  { %2562 = vrcp.f32 %v610_v20 }
 0x9aa   :  { %v2563_v21 = vpop.eup %2562 }
 0x9ab   :  { %v614_v24 = vmul.f32 %v2563_v21, %v521_v6 }
 0xa0e   :  { %v617_v22 = vpop.permute.xlu0 %616 }
 0xa0f   :  { %v619_v23 = vmul.f32 %v2563_v21, %v617_v22 }
 0xa11   :  { %621 = vrot.lane.b32.xlu1 %v619_v23, %s2814_s3 }
 0xa83   :  { %v622_v25 = vpop.permute.xlu1 %621 }
 0xa84   :  { %v624_v26 = vadd.f32 %v622_v25, %v614_v24  ;;  %v945_v24 = vld [vmem:[#allocation2 + $0xe] sm:$0x3] }
 0xa86   :  { %2564 = vtanh.f32 %v624_v26 }
 0xa90   :  { %v2565_v27 = vpop.eup %2564 }
 0xa91   :  { %627 = vrot.lane.b32.xlu0 %v2565_v27, %s2813_s12 }
 0xb03   :  { %v628_v28 = vpop.permute.xlu0 %627 }
 0xb04   :  { %v630_v29 = vmul.f32 %v2563_v21, %v628_v28 }
 0xb06   :  { %632 = vrot.lane.b32.xlu1 %v630_v29, %s2814_s3 }
 0xb78   :  { %v633_v30 = vpop.permute.xlu1 %632 }
 0xb79   :  { %635 = vst.msk [vmem:[#allocation3 + $0x6] sm:$0x3] %vm325_vm2, %v633_v30  ;;  %2262 = vmatmul.mubr.msk.f32.vlgmr.msra.gmra.mrb[4].mxu1 %vm222_vm3, %v633_v30 }
 0xb7a   :  { %2449 = vmatpush3.bf16.msra.mxu1 %v2993_v9  ;;  %2283 = vmatprep.mubr.msk.f32.mxu1 %vm2811_vm0, %v2812_v2 }
 0xb7b   :  { %2450 = vmatprep.subr.bf16.mxu1 %v2810_v1 }
 0xb7e   :  { %2452 = vmatpush3.bf16.msra.mxu1 %v2996_v13 }
 0xb80   :  { %v1048_v3 = vld [vmem:[#allocation3] sm:$0xff] }
 0xc4c   :  { %v705_v32 = vpop.f32.mrb[4].mxu1 }
 0xc4d   :  { %v709_v33 = vadd.f32 %v705_v32, %v636_v31  ;;  %v2263_v34 = vpop.f32.mrb[5].mxu1 }
 0xc4f   :  { %2566 = vtanh.f32 %v709_v33  ;;  %v2078_v36 = vmul.f32 -1.442695, %v709_v33 }
 0xc51   :  { %2568 = vpow2.f32 %v2078_v36 }
 0xc59   :  { %v2567_v35 = vpop.eup %2566 }
 0xc5a   :  { %719 = vrot.lane.b32.xlu0 %v2567_v35, %s2813_s12 }
 0xc5b   :  { %v2569_v37 = vpop.eup %2568 }
 0xc5c   :  { %v713_v38 = vadd.f32 1.0, %v2569_v37 }
 0xc5e   :  { %2570 = vrcp.f32 %v713_v38 }
 0xc68   :  { %v2571_v39 = vpop.eup %2570 }
 0xc69   :  { %v717_v42 = vmul.f32 %v2571_v39, %v624_v26 }
 0xccc   :  { %v720_v40 = vpop.permute.xlu0 %719 }
 0xccd   :  { %v722_v41 = vmul.f32 %v2571_v39, %v720_v40  ;;  %v1051_v40 = vld [vmem:[#allocation10 + $0x8] sm:$0xff] }
 0xccf   :  { %724 = vrot.lane.b32.xlu1 %v722_v41, %s2814_s3 }
 0xd41   :  { %v725_v43 = vpop.permute.xlu1 %724 }
 0xd42   :  { %v727_v44 = vadd.f32 %v725_v43, %v717_v42  ;;  %v1052_v42 = vld [vmem:[#allocation10 + $0x10] sm:$0xff]  ;;  %v1053_v43 = vld [vmem:[#allocation10 + $0x18] sm:$0xff] }
 0xd44   :  { %2572 = vtanh.f32 %v727_v44 }
 0xd4e   :  { %v2573_v45 = vpop.eup %2572 }
 0xd4f   :  { %730 = vrot.lane.b32.xlu0 %v2573_v45, %s2813_s12  ;;  %v1144_v45 = vld [vmem:[#allocation12] sm:$0xff] }
 0xdc1   :  { %v731_v46 = vpop.permute.xlu0 %730 }
 0xdc2   :  { %v733_v47 = vmul.f32 %v2571_v39, %v731_v46  ;;  %v1050_v39 = vld [vmem:[#allocation10] sm:$0xff]  ;;  %v1145_v46 = vld [vmem:[#allocation12 + $0x8] sm:$0xff] }
 0xdc3   :  { %v2459_v41 = vpack.c.bf16 %v1051_v40, %v1050_v39 }
 0xdc4   :  { %735 = vrot.lane.b32.xlu1 %v733_v47, %s2814_s3  ;;  %v1146_v47 = vld [vmem:[#allocation12 + $0x10] sm:$0xff] }
 0xdc5   :  { %2460 = vmatprep.subr.bf16.mxu1 %v2459_v41 }
 0xe36   :  { %v736_v48 = vpop.permute.xlu1 %735 }
 0xe37   :  { %738 = vst.msk [vmem:[#allocation3 + $0x8] sm:$0x3] %vm325_vm2, %v736_v48  ;;  %2273 = vmatmul.mubr.msk.f32.vlgmr.msra.gmra.mrb[6].mxu0 %vm222_vm3, %v736_v48  ;;  %v3097_v48 = vpack.c.bf16 %v1145_v46, %v1144_v45 }
 0xe38   :  { %2455 = vmatpush3.bf16.msra.mxu0 %v2993_v9  ;;  %2294 = vmatprep.mubr.msk.f32.mxu0 %vm2811_vm0, %v2812_v2 }
 0xe39   :  { %2456 = vmatprep.subr.bf16.mxu0 %v2810_v1 }
 0xe3c   :  { %2458 = vmatpush3.bf16.msra.mxu0 %v2996_v13 }
 0xe3d   :  { %2467 = vmatprep.subr.bf16.mxu0 %v2810_v1 }
 0xf0a   :  { %v808_v50 = vpop.f32.mrb[6].mxu0 }
 0xf0b   :  { %v812_v51 = vadd.f32 %v808_v50, %v739_v49  ;;  %v2274_v52 = vpop.f32.mrb[7].mxu0  ;;  %v1147_v49 = vld [vmem:[#allocation12 + $0x18] sm:$0xff] }
 0xf0c   :  { %v3100_v52 = vpack.c.bf16 %v1147_v49, %v1146_v47 }
 0xf0d   :  { %2574 = vtanh.f32 %v812_v51  ;;  %v2080_v54 = vmul.f32 -1.442695, %v812_v51 }
 0xf0f   :  { %2576 = vpow2.f32 %v2080_v54 }
 0xf17   :  { %v2575_v53 = vpop.eup %2574 }
 0xf18   :  { %822 = vrot.lane.b32.xlu0 %v2575_v53, %s2813_s12 }
 0xf19   :  { %v2577_v9 = vpop.eup %2576 }
 0xf1a   :  { %v816_v55 = vadd.f32 1.0, %v2577_v9 }
 0xf1c   :  { %2578 = vrcp.f32 %v816_v55 }
 0xf26   :  { %v2579_v56 = vpop.eup %2578 }
 0xf27   :  { %v820_v13 = vmul.f32 %v2579_v56, %v727_v44  ;;  %v2463_v44 = vpack.c.bf16 %v1053_v43, %v1052_v42 }
 0xf8a   :  { %v823_v57 = vpop.permute.xlu0 %822 }
 0xf8b   :  { %v825_v58 = vmul.f32 %v2579_v56, %v823_v57 }
 0xf8d   :  { %827 = vrot.lane.b32.xlu1 %v825_v58, %s2814_s3 }
 0xfff   :  { %v828_v59 = vpop.permute.xlu1 %827 }
0x1000   :  { %v830_v60 = vadd.f32 %v828_v59, %v820_v13 }
0x1002   :  { %2580 = vtanh.f32 %v830_v60 }
0x100c   :  { %v2581_v61 = vpop.eup %2580 }
0x100d   :  { %833 = vrot.lane.b32.xlu0 %v2581_v61, %s2813_s12 }
0x107f   :  { %v834_v62 = vpop.permute.xlu0 %833 }
0x1080   :  { %v836_v63 = vmul.f32 %v2579_v56, %v834_v62  ;;  %v2085_v56 = vld [vmem:[%s3212_s6] ss:$0 sm:$0xff] }
0x1082   :  { %838 = vrot.lane.b32.xlu1 %v836_v63, %s2814_s3 }
0x10f4   :  { %v839_v0 = vpop.permute.xlu1 %838 }
0x10f5   :  { %841 = vst.msk [vmem:[#allocation3 + $0xa] sm:$0x3] %vm325_vm2, %v839_v0  ;;  %2284 = vmatmul.mubr.msk.f32.vlgmr.msra.gmra.mrb[6].mxu1 %vm222_vm3, %v839_v0 }
0x10f6   :  { %2305 = vmatprep.mubr.msk.f32.mxu1 %vm222_vm3, %v1048_v3  ;;  %2462 = vmatpush3.bf16.msra.mxu1 %v2459_v41 }
0x10f7   :  { %2464 = vmatprep.subr.bf16.mxu1 %v2463_v44 }
0x10fa   :  { %2466 = vmatpush3.bf16.msra.mxu1 %v2463_v44 }
0x10fb   :  { %2473 = vmatprep.subr.bf16.mxu1 %v2810_v1 }
0x11c8   :  { %v911_v5 = vpop.f32.mrb[6].mxu1 }
0x11c9   :  { %v915_v6 = vadd.f32 %v911_v5, %v842_v4  ;;  %v2285_v7 = vpop.f32.mrb[7].mxu1 }
0x11cb   :  { %2582 = vtanh.f32 %v915_v6  ;;  %v2082_v10 = vmul.f32 -1.442695, %v915_v6 }
0x11cd   :  { %2584 = vpow2.f32 %v2082_v10 }
0x11d5   :  { %v2583_v8 = vpop.eup %2582 }
0x11d6   :  { %925 = vrot.lane.b32.xlu0 %v2583_v8, %s2813_s12 }
0x11d7   :  { %v2585_v11 = vpop.eup %2584 }
0x11d8   :  { %v919_v12 = vadd.f32 1.0, %v2585_v11 }
0x11da   :  { %2586 = vrcp.f32 %v919_v12 }
0x11e4   :  { %v2587_v14 = vpop.eup %2586 }
0x11e5   :  { %v923_v17 = vmul.f32 %v2587_v14, %v830_v60 }
0x1248   :  { %v926_v15 = vpop.permute.xlu0 %925 }
0x1249   :  { %v928_v16 = vmul.f32 %v2587_v14, %v926_v15 }
0x124b   :  { %930 = vrot.lane.b32.xlu1 %v928_v16, %s2814_s3 }
0x12bd   :  { %v931_v18 = vpop.permute.xlu1 %930 }
0x12be   :  { %v933_v19 = vadd.f32 %v931_v18, %v923_v17 }
0x12c0   :  { %2588 = vtanh.f32 %v933_v19 }
0x12ca   :  { %v2589_v20 = vpop.eup %2588 }
0x12cb   :  { %936 = vrot.lane.b32.xlu0 %v2589_v20, %s2813_s12 }
0x133d   :  { %v937_v21 = vpop.permute.xlu0 %936 }
0x133e   :  { %v939_v22 = vmul.f32 %v2587_v14, %v937_v21 }
0x1340   :  { %941 = vrot.lane.b32.xlu1 %v939_v22, %s2814_s3 }
0x13b2   :  { %v942_v23 = vpop.permute.xlu1 %941 }
0x13b3   :  { %944 = vst.msk [vmem:[#allocation3 + $0xc] sm:$0x3] %vm325_vm2, %v942_v23  ;;  %2295 = vmatmul.mubr.msk.f32.vlgmr.msra.gmra.mrb[8].mxu0 %vm222_vm3, %v942_v23 }
0x13b4   :  { %2316 = vmatprep.mubr.msk.f32.mxu0 %vm2811_vm0, %v2812_v2  ;;  %2469 = vmatpush3.bf16.msra.mxu0 %v3097_v48 }
0x13b5   :  { %2470 = vmatprep.subr.bf16.mxu0 %v2810_v1 }
0x13b8   :  { %2472 = vmatpush3.bf16.msra.mxu0 %v3100_v52 }
0x13b9   :  { %2479 = vmatprep.subr.bf16.mxu0 %v2810_v1 }
0x13bb   :  { %2317 = vmatmul.mubr.f32.vlgmr.msra.gmra.mrb[10].mxu0 %v2812_v2 }
0x13bc   :  { %2481 = vmatpush3.bf16.msra.mxu0 %v3097_v48  ;;  %2338 = vmatprep.mubr.msk.f32.mxu0 %vm2811_vm0, %v2812_v2 }
0x13bd   :  { %2482 = vmatprep.subr.bf16.mxu0 %v2810_v1 }
0x13c0   :  { %2484 = vmatpush3.bf16.msra.mxu0 %v3100_v52 }
0x13c1   :  { %2491 = vmatprep.subr.bf16.mxu0 %v2810_v1 }
0x1486   :  { %v1014_v25 = vpop.f32.mrb[8].mxu0 }
0x1487   :  { %v1018_v26 = vadd.f32 %v1014_v25, %v945_v24  ;;  %v2296_v27 = vpop.f32.mrb[9].mxu0 }
0x1489   :  { %2590 = vtanh.f32 %v1018_v26  ;;  %v2084_v29 = vmul.f32 -1.442695, %v1018_v26 }
0x148b   :  { %2592 = vpow2.f32 %v2084_v29 }
0x148e   :  { %v1215_v9 = vpop.f32.mrb[10].mxu0 }
0x148f   :  { %v2318_v55 = vpop.f32.mrb[11].mxu0 }
0x1493   :  { %v2591_v28 = vpop.eup %2590 }
0x1494   :  { %1028 = vrot.lane.b32.xlu0 %v2591_v28, %s2813_s12 }
0x1495   :  { %v2593_v30 = vpop.eup %2592 }
0x1496   :  { %v1022_v31 = vadd.f32 1.0, %v2593_v30 }
0x1498   :  { %2594 = vrcp.f32 %v1022_v31 }
0x14a2   :  { %v2595_v32 = vpop.eup %2594 }
0x14a3   :  { %v1026_v35 = vmul.f32 %v2595_v32, %v933_v19 }
0x1506   :  { %v1029_v33 = vpop.permute.xlu0 %1028 }
0x1507   :  { %v1031_v34 = vmul.f32 %v2595_v32, %v1029_v33 }
0x1509   :  { %1033 = vrot.lane.b32.xlu1 %v1031_v34, %s2814_s3 }
0x157b   :  { %v1034_v36 = vpop.permute.xlu1 %1033 }
0x157c   :  { %v1036_v37 = vadd.f32 %v1034_v36, %v1026_v35 }
0x157e   :  { %2596 = vtanh.f32 %v1036_v37 }
0x1588   :  { %v2597_v38 = vpop.eup %2596 }
0x1589   :  { %1039 = vrot.lane.b32.xlu0 %v2597_v38, %s2813_s12 }
0x15fb   :  { %v1040_v50 = vpop.permute.xlu0 %1039 }
0x15fc   :  { %v1042_v51 = vmul.f32 %v2595_v32, %v1040_v50 }
0x15fe   :  { %1044 = vrot.lane.b32.xlu1 %v1042_v51, %s2814_s3 }
0x1670   :  { %v1045_v53 = vpop.permute.xlu1 %1044 }
0x1671   :  { %1047 = vst.msk [vmem:[#allocation3 + $0xe] sm:$0x3] %vm325_vm2, %v1045_v53 }
0x1678   :  { %v1049_v54 = vld [vmem:[#allocation3 + $0x8] sm:$0xff] }
0x1679   :  { %2306 = vmatmul.mubr.msk.f32.vlgmr.msra.gmra.mrb[8].mxu1 %vm222_vm3, %v1049_v54 }
0x167a   :  { %2475 = vmatpush3.bf16.msra.mxu1 %v3097_v48  ;;  %2327 = vmatprep.mubr.msk.f32.mxu1 %vm2811_vm0, %v2812_v2 }
0x167b   :  { %2476 = vmatprep.subr.bf16.mxu1 %v2810_v1 }
0x167e   :  { %2478 = vmatpush3.bf16.msra.mxu1 %v3100_v52 }
0x167f   :  { %2485 = vmatprep.subr.bf16.mxu1 %v2810_v1 }
0x174c   :  { %v2307_v57 = vpop.f32.mrb[8].mxu1 }
0x174d   :  { %v1139_v58 = vadd.f32 %v2307_v57, %v2085_v56  ;;  %v1133_v13 = vpop.f32.mrb[9].mxu1 }
0x174e   :  { %v1134_v59 = vadd.f32 %v2085_v56, %v1133_v13 }
0x174f   :  { %1143 = vst [vmem:[#allocation2 + $0x8] sm:$0xff] %v1139_v58 }
0x1750   :  { %1142 = vst [vmem:[#allocation2] sm:$0xff] %v1134_v59 }
0x1757   :  { %v1148_v60 = vld [vmem:[#allocation2] sm:$0x3]  ;;  %v1244_v16 = vld [vmem:[#allocation2 + $0x2] sm:$0x3]  ;;  %v1345_v34 = vld [vmem:[#allocation2 + $0x4] sm:$0x3] }
0x1758   :  { %v1219_v61 = vadd.f32 %v1215_v9, %v1148_v60  ;;  %v1446_v54 = vld [vmem:[#allocation2 + $0x6] sm:$0x3] }
0x175a   :  { %2598 = vtanh.f32 %v1219_v61  ;;  %v2088_v63 = vmul.f32 -1.442695, %v1219_v61 }
0x175c   :  { %2600 = vpow2.f32 %v2088_v63 }
0x1764   :  { %v2599_v62 = vpop.eup %2598 }
0x1765   :  { %1229 = vrot.lane.b32.xlu0 %v2599_v62, %s2813_s12 }
0x1766   :  { %v2601_v0 = vpop.eup %2600 }
0x1767   :  { %v1223_v3 = vadd.f32 1.0, %v2601_v0 }
0x1769   :  { %2602 = vrcp.f32 %v1223_v3 }
0x1773   :  { %v2603_v4 = vpop.eup %2602 }
0x1774   :  { %v1227_v7 = vmul.f32 0.0, %v2603_v4 }
0x17d7   :  { %v1230_v5 = vpop.permute.xlu0 %1229 }
0x17d8   :  { %v1232_v6 = vmul.f32 %v2603_v4, %v1230_v5 }
0x17da   :  { %1234 = vrot.lane.b32.xlu1 %v1232_v6, %s2814_s3 }
0x184c   :  { %v1235_v8 = vpop.permute.xlu1 %1234 }
0x184d   :  { %v1237_v10 = vadd.f32 %v1235_v8, %v1227_v7  ;;  %v1547_v8 = vld [vmem:[#allocation2 + $0x8] sm:$0x3] }
0x184f   :  { %2604 = vtanh.f32 %v1237_v10 }
0x1859   :  { %v2605_v11 = vpop.eup %2604 }
0x185a   :  { %1240 = vrot.lane.b32.xlu0 %v2605_v11, %s2813_s12 }
0x18cc   :  { %v1241_v12 = vpop.permute.xlu0 %1240 }
0x18cd   :  { %v1243_v14 = vmul.f32 %v2603_v4, %v1241_v12 }
0x18cf   :  { %1246 = vrot.lane.b32.xlu1 %v1243_v14, %s2814_s3 }
0x1941   :  { %v1247_v15 = vpop.permute.xlu1 %1246 }
0x1942   :  { %2328 = vmatmul.mubr.msk.f32.vlgmr.msra.gmra.mrb[10].mxu1 %vm222_vm3, %v1247_v15 }
0x1943   :  { %2487 = vmatpush3.bf16.msra.mxu1 %v3097_v48  ;;  %2349 = vmatprep.mubr.msk.f32.mxu1 %vm2811_vm0, %v2812_v2 }
0x1944   :  { %2488 = vmatprep.subr.bf16.mxu1 %v2810_v1 }
0x1947   :  { %2490 = vmatpush3.bf16.msra.mxu1 %v3100_v52 }
0x1948   :  { %2497 = vmatprep.subr.bf16.mxu1 %v2810_v1 }
0x1a15   :  { %v1316_v17 = vpop.f32.mrb[10].mxu1 }
0x1a16   :  { %v1320_v18 = vadd.f32 %v1316_v17, %v1244_v16  ;;  %v2329_v19 = vpop.f32.mrb[11].mxu1 }
0x1a18   :  { %2606 = vtanh.f32 %v1320_v18  ;;  %v2090_v21 = vmul.f32 -1.442695, %v1320_v18 }
0x1a1a   :  { %2608 = vpow2.f32 %v2090_v21 }
0x1a22   :  { %v2607_v20 = vpop.eup %2606 }
0x1a23   :  { %1330 = vrot.lane.b32.xlu0 %v2607_v20, %s2813_s12 }
0x1a24   :  { %v2609_v22 = vpop.eup %2608 }
0x1a25   :  { %v1324_v23 = vadd.f32 1.0, %v2609_v22 }
0x1a27   :  { %2610 = vrcp.f32 %v1324_v23 }
0x1a31   :  { %v2611_v24 = vpop.eup %2610 }
0x1a32   :  { %v1328_v27 = vmul.f32 %v2611_v24, %v1237_v10 }
0x1a95   :  { %v1331_v25 = vpop.permute.xlu0 %1330 }
0x1a96   :  { %v1333_v26 = vmul.f32 %v2611_v24, %v1331_v25 }
0x1a98   :  { %1335 = vrot.lane.b32.xlu1 %v1333_v26, %s2814_s3 }
0x1b0a   :  { %v1336_v28 = vpop.permute.xlu1 %1335 }
0x1b0b   :  { %v1338_v29 = vadd.f32 %v1336_v28, %v1328_v27  ;;  %v1648_v28 = vld [vmem:[#allocation2 + $0xa] sm:$0x3] }
0x1b0d   :  { %2612 = vtanh.f32 %v1338_v29 }
0x1b17   :  { %v2613_v30 = vpop.eup %2612 }
0x1b18   :  { %1341 = vrot.lane.b32.xlu0 %v2613_v30, %s2813_s12 }
0x1b8a   :  { %v1342_v31 = vpop.permute.xlu0 %1341 }
0x1b8b   :  { %v1344_v32 = vmul.f32 %v2611_v24, %v1342_v31 }
0x1b8d   :  { %1347 = vrot.lane.b32.xlu1 %v1344_v32, %s2814_s3 }
0x1bff   :  { %v1348_v33 = vpop.permute.xlu1 %1347 }
0x1c00   :  { %2339 = vmatmul.mubr.msk.f32.vlgmr.msra.gmra.mrb[12].mxu0 %vm222_vm3, %v1348_v33 }
0x1c01   :  { %2493 = vmatpush3.bf16.msra.mxu0 %v3097_v48  ;;  %2360 = vmatprep.mubr.msk.f32.mxu0 %vm2811_vm0, %v2812_v2 }
0x1c02   :  { %2494 = vmatprep.subr.bf16.mxu0 %v2810_v1 }
0x1c05   :  { %2496 = vmatpush3.bf16.msra.mxu0 %v3100_v52 }
0x1c06   :  { %2503 = vmatprep.subr.bf16.mxu0 %v2810_v1 }
0x1cd3   :  { %v1417_v35 = vpop.f32.mrb[12].mxu0 }
0x1cd4   :  { %v1421_v36 = vadd.f32 %v1417_v35, %v1345_v34  ;;  %v2340_v37 = vpop.f32.mrb[13].mxu0 }
0x1cd6   :  { %2614 = vtanh.f32 %v1421_v36  ;;  %v2092_v39 = vmul.f32 -1.442695, %v1421_v36 }
0x1cd8   :  { %2616 = vpow2.f32 %v2092_v39 }
0x1ce0   :  { %v2615_v38 = vpop.eup %2614 }
0x1ce1   :  { %1431 = vrot.lane.b32.xlu0 %v2615_v38, %s2813_s12 }
0x1ce2   :  { %v2617_v40 = vpop.eup %2616 }
0x1ce3   :  { %v1425_v41 = vadd.f32 1.0, %v2617_v40 }
0x1ce5   :  { %2618 = vrcp.f32 %v1425_v41 }
0x1cef   :  { %v2619_v42 = vpop.eup %2618 }
0x1cf0   :  { %v1429_v45 = vmul.f32 %v2619_v42, %v1338_v29 }
0x1d53   :  { %v1432_v43 = vpop.permute.xlu0 %1431 }
0x1d54   :  { %v1434_v44 = vmul.f32 %v2619_v42, %v1432_v43 }
0x1d56   :  { %1436 = vrot.lane.b32.xlu1 %v1434_v44, %s2814_s3  ;;  %v1749_v44 = vld [vmem:[#allocation2 + $0xc] sm:$0x3] }
0x1dc8   :  { %v1437_v46 = vpop.permute.xlu1 %1436 }
0x1dc9   :  { %v1439_v47 = vadd.f32 %v1437_v46, %v1429_v45 }
0x1dcb   :  { %2620 = vtanh.f32 %v1439_v47 }
0x1dd5   :  { %v2621_v49 = vpop.eup %2620 }
0x1dd6   :  { %1442 = vrot.lane.b32.xlu0 %v2621_v49, %s2813_s12 }
0x1e48   :  { %v1443_v50 = vpop.permute.xlu0 %1442 }
0x1e49   :  { %v1445_v51 = vmul.f32 %v2619_v42, %v1443_v50 }
0x1e4b   :  { %1448 = vrot.lane.b32.xlu1 %v1445_v51, %s2814_s3 }
0x1ebd   :  { %v1449_v53 = vpop.permute.xlu1 %1448 }
0x1ebe   :  { %2350 = vmatmul.mubr.msk.f32.vlgmr.msra.gmra.mrb[12].mxu1 %vm222_vm3, %v1449_v53 }
0x1ebf   :  { %2499 = vmatpush3.bf16.msra.mxu1 %v3097_v48  ;;  %2371 = vmatprep.mubr.msk.f32.mxu1 %vm2811_vm0, %v2812_v2 }
0x1ec0   :  { %2500 = vmatprep.subr.bf16.mxu1 %v2810_v1 }
0x1ec3   :  { %2502 = vmatpush3.bf16.msra.mxu1 %v3100_v52 }
0x1ec4   :  { %2509 = vmatprep.subr.bf16.mxu1 %v2810_v1 }
0x1f91   :  { %v1518_v9 = vpop.f32.mrb[12].mxu1 }
0x1f92   :  { %v1522_v55 = vadd.f32 %v1518_v9, %v1446_v54  ;;  %v2351_v56 = vpop.f32.mrb[13].mxu1 }
0x1f94   :  { %2622 = vtanh.f32 %v1522_v55  ;;  %v2094_v58 = vmul.f32 -1.442695, %v1522_v55 }
0x1f96   :  { %2624 = vpow2.f32 %v2094_v58 }
0x1f9e   :  { %v2623_v57 = vpop.eup %2622 }
0x1f9f   :  { %1532 = vrot.lane.b32.xlu0 %v2623_v57, %s2813_s12 }
0x1fa0   :  { %v2625_v13 = vpop.eup %2624 }
0x1fa1   :  { %v1526_v59 = vadd.f32 1.0, %v2625_v13 }
0x1fa3   :  { %2626 = vrcp.f32 %v1526_v59 }
0x1fad   :  { %v2627_v60 = vpop.eup %2626 }
0x1fae   :  { %v1530_v63 = vmul.f32 %v2627_v60, %v1439_v47 }
0x2011   :  { %v1533_v61 = vpop.permute.xlu0 %1532 }
0x2012   :  { %v1535_v62 = vmul.f32 %v2627_v60, %v1533_v61  ;;  %v1850_v61 = vld [vmem:[#allocation2 + $0xe] sm:$0x3] }
0x2014   :  { %1537 = vrot.lane.b32.xlu1 %v1535_v62, %s2814_s3 }
0x2086   :  { %v1538_v0 = vpop.permute.xlu1 %1537 }
0x2087   :  { %v1540_v3 = vadd.f32 %v1538_v0, %v1530_v63 }
0x2089   :  { %2628 = vtanh.f32 %v1540_v3 }
0x2093   :  { %v2629_v4 = vpop.eup %2628 }
0x2094   :  { %1543 = vrot.lane.b32.xlu0 %v2629_v4, %s2813_s12 }
0x2106   :  { %v1544_v5 = vpop.permute.xlu0 %1543 }
0x2107   :  { %v1546_v6 = vmul.f32 %v2627_v60, %v1544_v5 }
0x2109   :  { %1549 = vrot.lane.b32.xlu1 %v1546_v6, %s2814_s3 }
0x217b   :  { %v1550_v7 = vpop.permute.xlu1 %1549 }
0x217c   :  { %2361 = vmatmul.mubr.msk.f32.vlgmr.msra.gmra.mrb[14].mxu0 %vm222_vm3, %v1550_v7 }
0x217d   :  { %2505 = vmatpush3.bf16.msra.mxu0 %v3097_v48  ;;  %2382 = vmatprep.mubr.msk.f32.mxu0 %vm2811_vm0, %v2812_v2 }
0x217e   :  { %2506 = vmatprep.subr.bf16.mxu0 %v2810_v1 }
0x2181   :  { %2508 = vmatpush3.bf16.msra.mxu0 %v3100_v52 }
0x2182   :  { %2515 = vmatprep.subr.bf16.mxu0 %v2810_v1 }
0x224f   :  { %v1619_v10 = vpop.f32.mrb[14].mxu0 }
0x2250   :  { %v1623_v11 = vadd.f32 %v1619_v10, %v1547_v8  ;;  %v2362_v12 = vpop.f32.mrb[15].mxu0 }
0x2252   :  { %2630 = vtanh.f32 %v1623_v11  ;;  %v2096_v15 = vmul.f32 -1.442695, %v1623_v11 }
0x2254   :  { %2632 = vpow2.f32 %v2096_v15  ;;  %v1951_v15 = vld [vmem:[#allocation13] sm:$0xff] }
0x225c   :  { %v2631_v14 = vpop.eup %2630 }
0x225d   :  { %1633 = vrot.lane.b32.xlu0 %v2631_v14, %s2813_s12 }
0x225e   :  { %v2633_v16 = vpop.eup %2632 }
0x225f   :  { %v1627_v17 = vadd.f32 1.0, %v2633_v16  ;;  %v1952_v16 = vld [vmem:[#allocation13 + $0x8] sm:$0xff] }
0x2261   :  { %2634 = vrcp.f32 %v1627_v17  ;;  %v1953_v17 = vld [vmem:[#allocation13 + $0x10] sm:$0xff] }
0x226b   :  { %v2635_v18 = vpop.eup %2634 }
0x226c   :  { %v1631_v21 = vmul.f32 %v2635_v18, %v1540_v3 }
0x22cf   :  { %v1634_v19 = vpop.permute.xlu0 %1633 }
0x22d0   :  { %v1636_v20 = vmul.f32 %v2635_v18, %v1634_v19  ;;  %v1954_v19 = vld [vmem:[#allocation13 + $0x18] sm:$0xff] }
0x22d2   :  { %1638 = vrot.lane.b32.xlu1 %v1636_v20, %s2814_s3  ;;  %v2519_v20 = vpack.c.bf16 %v1954_v19, %v1953_v17 }
0x2344   :  { %v1639_v22 = vpop.permute.xlu1 %1638 }
0x2345   :  { %v1641_v23 = vadd.f32 %v1639_v22, %v1631_v21 }
0x2347   :  { %2636 = vtanh.f32 %v1641_v23 }
0x2351   :  { %v2637_v24 = vpop.eup %2636 }
0x2352   :  { %1644 = vrot.lane.b32.xlu0 %v2637_v24, %s2813_s12 }
0x23c4   :  { %v1645_v25 = vpop.permute.xlu0 %1644 }
0x23c5   :  { %v1647_v26 = vmul.f32 %v2635_v18, %v1645_v25  ;;  %v2516_v18 = vpack.c.bf16 %v1952_v16, %v1951_v15  ;;  %v2103_v25 = vld [vmem:[%s3214_s8] ss:$0 sm:$0xff] }
0x23c7   :  { %1650 = vrot.lane.b32.xlu1 %v1647_v26, %s2814_s3 }
0x2439   :  { %v1651_v27 = vpop.permute.xlu1 %1650 }
0x243a   :  { %2372 = vmatmul.mubr.msk.f32.vlgmr.msra.gmra.mrb[14].mxu1 %vm222_vm3, %v1651_v27 }
0x243b   :  { %2511 = vmatpush3.bf16.msra.mxu1 %v3097_v48  ;;  %2393 = vmatprep.mubr.msk.f32.mxu1 %vm2811_vm0, %v2812_v2 }
0x243c   :  { %2512 = vmatprep.subr.bf16.mxu1 %v2810_v1 }
0x243f   :  { %2514 = vmatpush3.bf16.msra.mxu1 %v3100_v52 }
0x250d   :  { %v1720_v29 = vpop.f32.mrb[14].mxu1 }
0x250e   :  { %v1724_v30 = vadd.f32 %v1720_v29, %v1648_v28  ;;  %v2373_v31 = vpop.f32.mrb[15].mxu1 }
0x2510   :  { %2638 = vtanh.f32 %v1724_v30  ;;  %v2098_v33 = vmul.f32 -1.442695, %v1724_v30 }
0x2512   :  { %2640 = vpow2.f32 %v2098_v33 }
0x251a   :  { %v2639_v32 = vpop.eup %2638 }
0x251b   :  { %1734 = vrot.lane.b32.xlu0 %v2639_v32, %s2813_s12  ;;  %v2106_v32 = vld [vmem:[#allocation4] ss:$0 sm:$0xff] }
0x251c   :  { %v2641_v34 = vpop.eup %2640 }
0x251d   :  { %v1728_v35 = vadd.f32 1.0, %v2641_v34 }
0x251f   :  { %2642 = vrcp.f32 %v1728_v35 }
0x2529   :  { %v2643_v48 = vpop.eup %2642 }
0x252a   :  { %v1732_v38 = vmul.f32 %v2643_v48, %v1641_v23 }
0x258d   :  { %v1735_v36 = vpop.permute.xlu0 %1734 }
0x258e   :  { %v1737_v37 = vmul.f32 %v2643_v48, %v1735_v36 }
0x2590   :  { %1739 = vrot.lane.b32.xlu1 %v1737_v37, %s2814_s3 }
0x2602   :  { %v1740_v52 = vpop.permute.xlu1 %1739 }
0x2603   :  { %v1742_v39 = vadd.f32 %v1740_v52, %v1732_v38 }
0x2605   :  { %2644 = vtanh.f32 %v1742_v39 }
0x260f   :  { %v2645_v40 = vpop.eup %2644 }
0x2610   :  { %1745 = vrot.lane.b32.xlu0 %v2645_v40, %s2813_s12 }
0x2682   :  { %v1746_v41 = vpop.permute.xlu0 %1745 }
0x2683   :  { %v1748_v42 = vmul.f32 %v2643_v48, %v1746_v41 }
0x2685   :  { %1751 = vrot.lane.b32.xlu1 %v1748_v42, %s2814_s3 }
0x26f7   :  { %v1752_v43 = vpop.permute.xlu1 %1751 }
0x26f8   :  { %2383 = vmatmul.mubr.msk.f32.vlgmr.msra.gmra.mrb[16].mxu0 %vm222_vm3, %v1752_v43 }
0x26f9   :  { %2404 = vmatprep.mubr.msk.f32.mxu0 %vm2811_vm0, %v2812_v2  ;;  %2517 = vmatpush3.bf16.msra.mxu0 %v2516_v18 }
0x26fa   :  { %2518 = vmatprep.subr.bf16.mxu0 %v2810_v1  ;;  %v2105_v1 = vld [vmem:[%s3215_s9] ss:$0 sm:$0xff] }
0x26fd   :  { %2520 = vmatpush3.bf16.msra.mxu0 %v2519_v20 }
0x27cb   :  { %v1821_v45 = vpop.f32.mrb[16].mxu0 }
0x27cc   :  { %v1825_v46 = vadd.f32 %v1821_v45, %v1749_v44  ;;  %v2384_v47 = vpop.f32.mrb[17].mxu0 }
0x27ce   :  { %2646 = vtanh.f32 %v1825_v46  ;;  %v2100_v50 = vmul.f32 -1.442695, %v1825_v46 }
0x27d0   :  { %2648 = vpow2.f32 %v2100_v50 }
0x27d8   :  { %v2647_v49 = vpop.eup %2646 }
0x27d9   :  { %1835 = vrot.lane.b32.xlu0 %v2647_v49, %s2813_s12 }
0x27da   :  { %v2649_v51 = vpop.eup %2648 }
0x27db   :  { %v1829_v53 = vadd.f32 1.0, %v2649_v51 }
0x27dd   :  { %2650 = vrcp.f32 %v1829_v53 }
0x27e7   :  { %v2651_v54 = vpop.eup %2650 }
0x27e8   :  { %v1833_v56 = vmul.f32 %v2651_v54, %v1742_v39 }
0x284b   :  { %v1836_v9 = vpop.permute.xlu0 %1835 }
0x284c   :  { %v1838_v55 = vmul.f32 %v2651_v54, %v1836_v9 }
0x284e   :  { %1840 = vrot.lane.b32.xlu1 %v1838_v55, %s2814_s3 }
0x28c0   :  { %v1841_v2 = vpop.permute.xlu1 %1840 }
0x28c1   :  { %v1843_v57 = vadd.f32 %v1841_v2, %v1833_v56 }
0x28c3   :  { %2652 = vtanh.f32 %v1843_v57 }
0x28cd   :  { %v2653_v58 = vpop.eup %2652 }
0x28ce   :  { %1846 = vrot.lane.b32.xlu0 %v2653_v58, %s2813_s12 }
0x2940   :  { %v1847_v13 = vpop.permute.xlu0 %1846 }
0x2941   :  { %v1849_v59 = vmul.f32 %v2651_v54, %v1847_v13 }
0x2943   :  { %1852 = vrot.lane.b32.xlu1 %v1849_v59, %s2814_s3 }
0x29b5   :  { %v1853_v60 = vpop.permute.xlu1 %1852 }
0x29b6   :  { %2394 = vmatmul.mubr.msk.f32.vlgmr.msra.gmra.mrb[16].mxu1 %vm222_vm3, %v1853_v60 }
0x2a89   :  { %v1922_v62 = vpop.f32.mrb[16].mxu1 }
0x2a8a   :  { %v1926_v63 = vadd.f32 %v1922_v62, %v1850_v61  ;;  %v2395_v0 = vpop.f32.mrb[17].mxu1 }
0x2a8c   :  { %2654 = vtanh.f32 %v1926_v63  ;;  %v2102_v4 = vmul.f32 -1.442695, %v1926_v63 }
0x2a8e   :  { %2656 = vpow2.f32 %v2102_v4 }
0x2a96   :  { %v2655_v3 = vpop.eup %2654 }
0x2a97   :  { %1936 = vrot.lane.b32.xlu0 %v2655_v3, %s2813_s12 }
0x2a98   :  { %v2657_v5 = vpop.eup %2656 }
0x2a99   :  { %v1930_v6 = vadd.f32 1.0, %v2657_v5 }
0x2a9b   :  { %2658 = vrcp.f32 %v1930_v6 }
0x2aa5   :  { %v2659_v7 = vpop.eup %2658 }
0x2aa6   :  { %v1934_v11 = vmul.f32 %v2659_v7, %v1843_v57 }
0x2b09   :  { %v1937_v8 = vpop.permute.xlu0 %1936 }
0x2b0a   :  { %v1939_v10 = vmul.f32 %v2659_v7, %v1937_v8 }
0x2b0c   :  { %1941 = vrot.lane.b32.xlu1 %v1939_v10, %s2814_s3 }
0x2b7e   :  { %v1942_v12 = vpop.permute.xlu1 %1941 }
0x2b7f   :  { %v1944_v14 = vadd.f32 %v1942_v12, %v1934_v11 }
0x2b81   :  { %2660 = vtanh.f32 %v1944_v14 }
0x2b8b   :  { %v2661_v21 = vpop.eup %2660 }
0x2b8c   :  { %1947 = vrot.lane.b32.xlu0 %v2661_v21, %s2813_s12 }
0x2bfe   :  { %v1948_v22 = vpop.permute.xlu0 %1947 }
0x2bff   :  { %v1950_v23 = vmul.f32 %v2659_v7, %v1948_v22 }
0x2c01   :  { %1963 = vrot.lane.b32.xlu1 %v1950_v23, %s2814_s3 }
0x2c73   :  { %v1964_v24 = vpop.permute.xlu1 %1963 }
0x2c74   :  { %2405 = vmatmul.mubr.msk.f32.vlgmr.msra.gmra.mrb[18].mxu0 %vm222_vm3, %v1964_v24 }
0x2d47   :  { %v2033_v26 = vpop.f32.mrb[18].mxu0 }
0x2d48   :  { %v2034_v27 = vadd.f32 %v2103_v25, %v2033_v26  ;;  %v2406_v28 = vpop.f32.mrb[19].mxu0 }
0x2d4a   :  { %v2037_v29 = vmax.f32 %v2034_v27, 0.0 }
0x2d4c   :  { %v2045_v30 = vmul.f32 %v2105_v1, %v2037_v29 }
0x2d4e   :  { %v2046_v31 = vsel %vm325_vm2, %v2045_v30, 0.0 }
0x2d4f   :  { %2047 = vadd.xlane.f32.xlu0 %v2046_v31 }
0x2ddc   :  { %v2048_v33 = vpop.xlane.xlu0 %2047 }
0x2ddd   :  { %v2056_v34 = vadd.f32 %v2106_v32, %v2048_v33 }
0x2ddf   :  { %2058 = vst.msk [vmem:[%s3217_s11] sm:$0x3] %vm2057_vm4, %v2056_v34 }
0x2de0   :  { %2063 = vsyncpa [#allocation6], 1 }
0x2de1   :  { %2064 = vsyncpa [#allocation8], 1 }
0x2de2   :  { %2065 = vsyncpa [#allocation11], 1 }
0x2de3   :  { %2066 = vsyncpa [#allocation14], 1 }

</bundles_post_ra>
